<compile_context>
chip_gen: v7x
topology: tpu7x:2x2x1
jax: 0.10.0
libtpu: 0.0.40
codegen_flags: <defaults>
</compile_context>

<pallas_src>
import math
import jax
import jax.numpy as jnp
from jax import lax
from jax.experimental import pallas as pl
from jax.experimental.pallas import tpu as pltpu


def _lstm_head_kernel(ids_ref,                       # (B, T) int32, SMEM
                      proj1_ref,                     # (V, 4H) = emb @ Wih1^T + b1
                      whh1_ref,                      # (H, 4H)
                      wih2_ref, whh2_ref, b2_ref,    # (H,4H) (H,4H) (1,4H)
                      fcw_ref, fcb_ref,              # (H,H)  (1,H)
                      lw_ref, lb_ref,                # (H,1)  (1,1)
                      out_ref):                      # (B,1)
    B, T = ids_ref.shape
    H = whh1_ref.shape[0]

    def gates(z, c):
        # PyTorch gate order [i, f, g, o]; one full-vreg sigmoid + one full-vreg
        # tanh, then cheap 32-lane slices (2 EUP passes instead of 4 per step).
        sig = jax.nn.sigmoid(z)
        th = jnp.tanh(z)
        i = sig[:, 0:H]
        f = sig[:, H:2 * H]
        g = th[:, 2 * H:3 * H]
        o = sig[:, 3 * H:4 * H]
        c_new = f * c + i * g
        h_new = o * jnp.tanh(c_new)
        return h_new, c_new

    h = jnp.zeros((B, H), jnp.float32)
    c = jnp.zeros((B, H), jnp.float32)

    # --- rnn1: input projection (and bias) pre-folded into proj1; fully unrolled.
    whh1 = whh1_ref[...]
    h1_seq = []
    for t in range(T):
        # fused embedding + layer-1 input projection: one lane-dense 128-wide
        # row gather per (b, t), indices read as scalars from SMEM.
        xp1_t = jnp.concatenate(
            [proj1_ref[pl.ds(ids_ref[b, t], 1), :] for b in range(B)], axis=0)
        z = xp1_t + jnp.dot(h, whh1, preferred_element_type=jnp.float32)
        h, c = gates(z, c)
        h1_seq.append(h)

    # --- rnn2: initial state = final (h, c) of rnn1 (matches
    #     `self.rnn2(result, hidden)` in the PyTorch forward).  The layer-2
    #     input projection is hoisted out of the recurrence as one well-shaped
    #     (T*B, H) @ (H, 4H) matmul; the per-step body is just xp2[t] + h @ whh2.
    seq1 = jnp.concatenate(h1_seq, axis=0)                        # (T*B, H), t-major
    xp2 = (jnp.dot(seq1, wih2_ref[...], preferred_element_type=jnp.float32)
           + b2_ref[...])                                         # (T*B, 4H)
    whh2 = whh2_ref[...]
    for t in range(T):
        z = xp2[t * B:(t + 1) * B, :] + jnp.dot(
            h, whh2, preferred_element_type=jnp.float32)
        h, c = gates(z, c)

    # --- fc -> relu -> logits (h == result[-1] of rnn2) ---
    fc = jnp.maximum(
        jnp.dot(h, fcw_ref[...], preferred_element_type=jnp.float32) + fcb_ref[...],
        0.0)
    out_ref[...] = (jnp.dot(fc, lw_ref[...], preferred_element_type=jnp.float32)
                    + lb_ref[...])                                # (B, 1)


def configurable_model_forward(x_tokens, emb_table, params):
    """x_tokens: (B, T) int32 token ids; emb_table: (V, E) float32."""
    B, T = x_tokens.shape
    H = params["whh1"].shape[1]          # whh stored (4H, H)

    # Parameter prep (would be folded into the params once in a real model):
    #  - layer-1 input projection + bias baked into the embedding table,
    #  - remaining weights pre-transposed so the kernel computes x @ W directly.
    proj1 = (emb_table.astype(jnp.float32) @ params["wih1"].T
             + params["b1"]).astype(jnp.float32)                  # (V, 4H)

    args = (
        x_tokens.astype(jnp.int32),
        proj1,
        params["whh1"].T,
        params["wih2"].T, params["whh2"].T, params["b2"].reshape(1, 4 * H),
        params["fcw"].T, params["fcb"].reshape(1, H),
        params["lw"].T, params["lb"].reshape(1, 1),
    )
    smem = pl.BlockSpec(memory_space=pltpu.MemorySpace.SMEM)
    vmem = pl.BlockSpec(memory_space=pltpu.MemorySpace.VMEM)
    out = pl.pallas_call(
        _lstm_head_kernel,
        out_shape=jax.ShapeDtypeStruct((B, 1), jnp.float32),
        in_specs=[smem] + [vmem] * (len(args) - 1),
        out_specs=vmem,
        # footprint is ~tens of KiB: default scoped-VMEM limit is plenty on
        # v5e/v6e/v7x, so no vmem_limit override (keeps v7x's 64 MiB safe).
    )(*args)
    return out[:, 0]                     # == result.squeeze(-1) -> (B,)


# ----------------------------- reference (pure JAX) --------------------------
def _ref_forward(x_tokens, emb_table, params):
    H = params["whh1"].shape[1]
    emb = jnp.take(emb_table, x_tokens, axis=0)
    emb = jnp.transpose(emb, (1, 0, 2)).astype(jnp.float32)       # (T, B, E)

    def cell(x_t, h, c, wih, whh, b):
        z = x_t @ wih.T + h @ whh.T + b
        i = jax.nn.sigmoid(z[:, 0:H])
        f = jax.nn.sigmoid(z[:, H:2 * H])
        g = jnp.tanh(z[:, 2 * H:3 * H])
        o = jax.nn.sigmoid(z[:, 3 * H:4 * H])
        c = f * c + i * g
        return o * jnp.tanh(c), c

    B = x_tokens.shape[0]
    z0 = jnp.zeros((B, H), jnp.float32)

    def step1(carry, x_t):
        h, c = carry
        h, c = cell(x_t, h, c, params["wih1"], params["whh1"], params["b1"])
        return (h, c), h

    (h1, c1), seq1 = lax.scan(step1, (z0, z0), emb)

    def step2(carry, x_t):
        h, c = carry
        h, c = cell(x_t, h, c, params["wih2"], params["whh2"], params["b2"])
        return (h, c), h

    (h2, _), _ = lax.scan(step2, (h1, c1), seq1)
    fc = jnp.maximum(h2 @ params["fcw"].T + params["fcb"], 0.0)
    return (fc @ params["lw"].T + params["lb"])[:, 0]


if __name__ == "__main__":
    V, E, B, T = 50, 64, 2, 8
    H = E // 2  # hidden_size defaults to input_size / 2 -> 32

    key = jax.random.PRNGKey(0)
    ks = jax.random.split(key, 12)
    u = 1.0 / math.sqrt(H)

    emb_table = jax.random.normal(ks[0], (V, E), jnp.float32) * 0.1
    params = {
        # LSTM layer 1 (PyTorch layout: weight_ih (4H, E), weight_hh (4H, H)),
        # biases b_ih + b_hh pre-summed into a single (4H,) vector.
        "wih1": jax.random.uniform(ks[1], (4 * H, E), jnp.float32, -u, u),
        "whh1": jax.random.uniform(ks[2], (4 * H, H), jnp.float32, -u, u),
        "b1":   jax.random.uniform(ks[3], (4 * H,), jnp.float32, -u, u),
        # LSTM layer 2
        "wih2": jax.random.uniform(ks[4], (4 * H, H), jnp.float32, -u, u),
        "whh2": jax.random.uniform(ks[5], (4 * H, H), jnp.float32, -u, u),
        "b2":   jax.random.uniform(ks[6], (4 * H,), jnp.float32, -u, u),
        # fc: kaiming normal (fan_in, relu), zero bias
        "fcw":  jax.random.normal(ks[7], (H, H), jnp.float32) * math.sqrt(2.0 / H),
        "fcb":  jnp.zeros((H,), jnp.float32),
        # logits: default nn.Linear reset
        "lw":   jax.random.uniform(ks[8], (1, H), jnp.float32, -u, u),
        "lb":   jax.random.uniform(ks[9], (1,), jnp.float32, -u, u),
    }

    x_tokens = jax.random.randint(ks[10], (B, T), 0, V, dtype=jnp.int32)

    out = configurable_model_forward(x_tokens, emb_table, params)
    out = jax.block_until_ready(out)

    ref = _ref_forward(x_tokens, emb_table, params)
    assert out.shape == (B,)
    assert jnp.allclose(out, ref, atol=1e-4, rtol=1e-4), (out, ref)
    print("KERNEL_OK")
</pallas_src>

<mosaic_0001>
module attributes {stable_mosaic.version = 11 : i64} {
  func.func @_lstm_head_kernel(%arg0: memref<2x8xi32, #tpu.memory_space<smem>>, %arg1: memref<50x128xf32, #tpu.memory_space<vmem>>, %arg2: memref<32x128xf32, #tpu.memory_space<vmem>>, %arg3: memref<32x128xf32, #tpu.memory_space<vmem>>, %arg4: memref<32x128xf32, #tpu.memory_space<vmem>>, %arg5: memref<1x128xf32, #tpu.memory_space<vmem>>, %arg6: memref<32x32xf32, #tpu.memory_space<vmem>>, %arg7: memref<1x32xf32, #tpu.memory_space<vmem>>, %arg8: memref<32x1xf32, #tpu.memory_space<vmem>>, %arg9: memref<1x1xf32, #tpu.memory_space<vmem>>, %arg10: memref<2x1xf32, #tpu.memory_space<vmem>>) attributes {dimension_semantics = [], scalar_prefetch = 0 : i64, scratch_operands = 0 : i64, tpu.core_type = #tpu.core_type<tc>} {
    %cst = arith.constant 0.000000e+00 : f32
    %0 = vector.broadcast %cst : f32 to vector<2x32xf32>
    %cst_0 = arith.constant 0.000000e+00 : f32
    %1 = vector.broadcast %cst_0 : f32 to vector<2x32xf32>
    %c0 = arith.constant 0 : index
    %c0_1 = arith.constant 0 : index
    %2 = vector.load %arg2[%c0, %c0_1] : memref<32x128xf32, #tpu.memory_space<vmem>>, vector<32x128xf32>
    %c0_2 = arith.constant 0 : index
    %c0_3 = arith.constant 0 : index
    %3 = memref.load %arg0[%c0_2, %c0_3] : memref<2x8xi32, #tpu.memory_space<smem>>
    %4 = arith.index_cast %3 : i32 to index
    %c0_4 = arith.constant 0 : index
    %5 = vector.load %arg1[%4, %c0_4] : memref<50x128xf32, #tpu.memory_space<vmem>>, vector<1x128xf32>
    %c1 = arith.constant 1 : index
    %c0_5 = arith.constant 0 : index
    %6 = memref.load %arg0[%c1, %c0_5] : memref<2x8xi32, #tpu.memory_space<smem>>
    %7 = arith.index_cast %6 : i32 to index
    %c0_6 = arith.constant 0 : index
    %8 = vector.load %arg1[%7, %c0_6] : memref<50x128xf32, #tpu.memory_space<vmem>>, vector<1x128xf32>
    %9 = tpu.concatenate %5, %8 in 0 : vector<1x128xf32>, vector<1x128xf32> -> vector<2x128xf32>
    %cst_7 = arith.constant dense<0.000000e+00> : vector<2x128xf32>
    %10 = tpu.matmul %0, %2, %cst_7 {dimension_numbers = #tpu.dot_dimension_numbers<[1], [0], [0], [1], [0, 0, 1, 1], [], []>} : vector<2x32xf32>, vector<32x128xf32>, vector<2x128xf32> -> vector<2x128xf32>
    %11 = arith.addf %9, %10 : vector<2x128xf32>
    %12 = arith.negf %11 : vector<2x128xf32>
    %13 = math.exp %12 : vector<2x128xf32>
    %cst_8 = arith.constant 1.000000e+00 : f32
    %14 = vector.broadcast %cst_8 : f32 to vector<2x128xf32>
    %15 = arith.addf %14, %13 : vector<2x128xf32>
    %16 = arith.divf %14, %15 : vector<2x128xf32>
    %17 = math.tanh %11 : vector<2x128xf32>
    %18 = vector.extract_strided_slice %16 {offsets = [0, 0], sizes = [2, 32], strides = [1, 1]} : vector<2x128xf32> to vector<2x32xf32>
    %19 = vector.extract_strided_slice %16 {offsets = [0, 32], sizes = [2, 32], strides = [1, 1]} : vector<2x128xf32> to vector<2x32xf32>
    %20 = vector.extract_strided_slice %17 {offsets = [0, 64], sizes = [2, 32], strides = [1, 1]} : vector<2x128xf32> to vector<2x32xf32>
    %21 = vector.extract_strided_slice %16 {offsets = [0, 96], sizes = [2, 32], strides = [1, 1]} : vector<2x128xf32> to vector<2x32xf32>
    %22 = arith.mulf %19, %1 : vector<2x32xf32>
    %23 = arith.mulf %18, %20 : vector<2x32xf32>
    %24 = arith.addf %22, %23 : vector<2x32xf32>
    %25 = math.tanh %24 : vector<2x32xf32>
    %26 = arith.mulf %21, %25 : vector<2x32xf32>
    %c0_9 = arith.constant 0 : index
    %c1_10 = arith.constant 1 : index
    %27 = memref.load %arg0[%c0_9, %c1_10] : memref<2x8xi32, #tpu.memory_space<smem>>
    %28 = arith.index_cast %27 : i32 to index
    %c0_11 = arith.constant 0 : index
    %29 = vector.load %arg1[%28, %c0_11] : memref<50x128xf32, #tpu.memory_space<vmem>>, vector<1x128xf32>
    %c1_12 = arith.constant 1 : index
    %c1_13 = arith.constant 1 : index
    %30 = memref.load %arg0[%c1_12, %c1_13] : memref<2x8xi32, #tpu.memory_space<smem>>
    %31 = arith.index_cast %30 : i32 to index
    %c0_14 = arith.constant 0 : index
    %32 = vector.load %arg1[%31, %c0_14] : memref<50x128xf32, #tpu.memory_space<vmem>>, vector<1x128xf32>
    %33 = tpu.concatenate %29, %32 in 0 : vector<1x128xf32>, vector<1x128xf32> -> vector<2x128xf32>
    %cst_15 = arith.constant dense<0.000000e+00> : vector<2x128xf32>
    %34 = tpu.matmul %26, %2, %cst_15 {dimension_numbers = #tpu.dot_dimension_numbers<[1], [0], [0], [1], [0, 0, 1, 1], [], []>} : vector<2x32xf32>, vector<32x128xf32>, vector<2x128xf32> -> vector<2x128xf32>
    %35 = arith.addf %33, %34 : vector<2x128xf32>
    %36 = arith.negf %35 : vector<2x128xf32>
    %37 = math.exp %36 : vector<2x128xf32>
    %cst_16 = arith.constant 1.000000e+00 : f32
    %38 = vector.broadcast %cst_16 : f32 to vector<2x128xf32>
    %39 = arith.addf %38, %37 : vector<2x128xf32>
    %40 = arith.divf %38, %39 : vector<2x128xf32>
    %41 = math.tanh %35 : vector<2x128xf32>
    %42 = vector.extract_strided_slice %40 {offsets = [0, 0], sizes = [2, 32], strides = [1, 1]} : vector<2x128xf32> to vector<2x32xf32>
    %43 = vector.extract_strided_slice %40 {offsets = [0, 32], sizes = [2, 32], strides = [1, 1]} : vector<2x128xf32> to vector<2x32xf32>
    %44 = vector.extract_strided_slice %41 {offsets = [0, 64], sizes = [2, 32], strides = [1, 1]} : vector<2x128xf32> to vector<2x32xf32>
    %45 = vector.extract_strided_slice %40 {offsets = [0, 96], sizes = [2, 32], strides = [1, 1]} : vector<2x128xf32> to vector<2x32xf32>
    %46 = arith.mulf %43, %24 : vector<2x32xf32>
    %47 = arith.mulf %42, %44 : vector<2x32xf32>
    %48 = arith.addf %46, %47 : vector<2x32xf32>
    %49 = math.tanh %48 : vector<2x32xf32>
    %50 = arith.mulf %45, %49 : vector<2x32xf32>
    %c0_17 = arith.constant 0 : index
    %c2 = arith.constant 2 : index
    %51 = memref.load %arg0[%c0_17, %c2] : memref<2x8xi32, #tpu.memory_space<smem>>
    %52 = arith.index_cast %51 : i32 to index
    %c0_18 = arith.constant 0 : index
    %53 = vector.load %arg1[%52, %c0_18] : memref<50x128xf32, #tpu.memory_space<vmem>>, vector<1x128xf32>
    %c1_19 = arith.constant 1 : index
    %c2_20 = arith.constant 2 : index
    %54 = memref.load %arg0[%c1_19, %c2_20] : memref<2x8xi32, #tpu.memory_space<smem>>
    %55 = arith.index_cast %54 : i32 to index
    %c0_21 = arith.constant 0 : index
    %56 = vector.load %arg1[%55, %c0_21] : memref<50x128xf32, #tpu.memory_space<vmem>>, vector<1x128xf32>
    %57 = tpu.concatenate %53, %56 in 0 : vector<1x128xf32>, vector<1x128xf32> -> vector<2x128xf32>
    %cst_22 = arith.constant dense<0.000000e+00> : vector<2x128xf32>
    %58 = tpu.matmul %50, %2, %cst_22 {dimension_numbers = #tpu.dot_dimension_numbers<[1], [0], [0], [1], [0, 0, 1, 1], [], []>} : vector<2x32xf32>, vector<32x128xf32>, vector<2x128xf32> -> vector<2x128xf32>
    %59 = arith.addf %57, %58 : vector<2x128xf32>
    %60 = arith.negf %59 : vector<2x128xf32>
    %61 = math.exp %60 : vector<2x128xf32>
    %cst_23 = arith.constant 1.000000e+00 : f32
    %62 = vector.broadcast %cst_23 : f32 to vector<2x128xf32>
    %63 = arith.addf %62, %61 : vector<2x128xf32>
    %64 = arith.divf %62, %63 : vector<2x128xf32>
    %65 = math.tanh %59 : vector<2x128xf32>
    %66 = vector.extract_strided_slice %64 {offsets = [0, 0], sizes = [2, 32], strides = [1, 1]} : vector<2x128xf32> to vector<2x32xf32>
    %67 = vector.extract_strided_slice %64 {offsets = [0, 32], sizes = [2, 32], strides = [1, 1]} : vector<2x128xf32> to vector<2x32xf32>
    %68 = vector.extract_strided_slice %65 {offsets = [0, 64], sizes = [2, 32], strides = [1, 1]} : vector<2x128xf32> to vector<2x32xf32>
    %69 = vector.extract_strided_slice %64 {offsets = [0, 96], sizes = [2, 32], strides = [1, 1]} : vector<2x128xf32> to vector<2x32xf32>
    %70 = arith.mulf %67, %48 : vector<2x32xf32>
    %71 = arith.mulf %66, %68 : vector<2x32xf32>
    %72 = arith.addf %70, %71 : vector<2x32xf32>
    %73 = math.tanh %72 : vector<2x32xf32>
    %74 = arith.mulf %69, %73 : vector<2x32xf32>
    %c0_24 = arith.constant 0 : index
    %c3 = arith.constant 3 : index
    %75 = memref.load %arg0[%c0_24, %c3] : memref<2x8xi32, #tpu.memory_space<smem>>
    %76 = arith.index_cast %75 : i32 to index
    %c0_25 = arith.constant 0 : index
    %77 = vector.load %arg1[%76, %c0_25] : memref<50x128xf32, #tpu.memory_space<vmem>>, vector<1x128xf32>
    %c1_26 = arith.constant 1 : index
    %c3_27 = arith.constant 3 : index
    %78 = memref.load %arg0[%c1_26, %c3_27] : memref<2x8xi32, #tpu.memory_space<smem>>
    %79 = arith.index_cast %78 : i32 to index
    %c0_28 = arith.constant 0 : index
    %80 = vector.load %arg1[%79, %c0_28] : memref<50x128xf32, #tpu.memory_space<vmem>>, vector<1x128xf32>
    %81 = tpu.concatenate %77, %80 in 0 : vector<1x128xf32>, vector<1x128xf32> -> vector<2x128xf32>
    %cst_29 = arith.constant dense<0.000000e+00> : vector<2x128xf32>
    %82 = tpu.matmul %74, %2, %cst_29 {dimension_numbers = #tpu.dot_dimension_numbers<[1], [0], [0], [1], [0, 0, 1, 1], [], []>} : vector<2x32xf32>, vector<32x128xf32>, vector<2x128xf32> -> vector<2x128xf32>
    %83 = arith.addf %81, %82 : vector<2x128xf32>
    %84 = arith.negf %83 : vector<2x128xf32>
    %85 = math.exp %84 : vector<2x128xf32>
    %cst_30 = arith.constant 1.000000e+00 : f32
    %86 = vector.broadcast %cst_30 : f32 to vector<2x128xf32>
    %87 = arith.addf %86, %85 : vector<2x128xf32>
    %88 = arith.divf %86, %87 : vector<2x128xf32>
    %89 = math.tanh %83 : vector<2x128xf32>
    %90 = vector.extract_strided_slice %88 {offsets = [0, 0], sizes = [2, 32], strides = [1, 1]} : vector<2x128xf32> to vector<2x32xf32>
    %91 = vector.extract_strided_slice %88 {offsets = [0, 32], sizes = [2, 32], strides = [1, 1]} : vector<2x128xf32> to vector<2x32xf32>
    %92 = vector.extract_strided_slice %89 {offsets = [0, 64], sizes = [2, 32], strides = [1, 1]} : vector<2x128xf32> to vector<2x32xf32>
    %93 = vector.extract_strided_slice %88 {offsets = [0, 96], sizes = [2, 32], strides = [1, 1]} : vector<2x128xf32> to vector<2x32xf32>
    %94 = arith.mulf %91, %72 : vector<2x32xf32>
    %95 = arith.mulf %90, %92 : vector<2x32xf32>
    %96 = arith.addf %94, %95 : vector<2x32xf32>
    %97 = math.tanh %96 : vector<2x32xf32>
    %98 = arith.mulf %93, %97 : vector<2x32xf32>
    %c0_31 = arith.constant 0 : index
    %c4 = arith.constant 4 : index
    %99 = memref.load %arg0[%c0_31, %c4] : memref<2x8xi32, #tpu.memory_space<smem>>
    %100 = arith.index_cast %99 : i32 to index
    %c0_32 = arith.constant 0 : index
    %101 = vector.load %arg1[%100, %c0_32] : memref<50x128xf32, #tpu.memory_space<vmem>>, vector<1x128xf32>
    %c1_33 = arith.constant 1 : index
    %c4_34 = arith.constant 4 : index
    %102 = memref.load %arg0[%c1_33, %c4_34] : memref<2x8xi32, #tpu.memory_space<smem>>
    %103 = arith.index_cast %102 : i32 to index
    %c0_35 = arith.constant 0 : index
    %104 = vector.load %arg1[%103, %c0_35] : memref<50x128xf32, #tpu.memory_space<vmem>>, vector<1x128xf32>
    %105 = tpu.concatenate %101, %104 in 0 : vector<1x128xf32>, vector<1x128xf32> -> vector<2x128xf32>
    %cst_36 = arith.constant dense<0.000000e+00> : vector<2x128xf32>
    %106 = tpu.matmul %98, %2, %cst_36 {dimension_numbers = #tpu.dot_dimension_numbers<[1], [0], [0], [1], [0, 0, 1, 1], [], []>} : vector<2x32xf32>, vector<32x128xf32>, vector<2x128xf32> -> vector<2x128xf32>
    %107 = arith.addf %105, %106 : vector<2x128xf32>
    %108 = arith.negf %107 : vector<2x128xf32>
    %109 = math.exp %108 : vector<2x128xf32>
    %cst_37 = arith.constant 1.000000e+00 : f32
    %110 = vector.broadcast %cst_37 : f32 to vector<2x128xf32>
    %111 = arith.addf %110, %109 : vector<2x128xf32>
    %112 = arith.divf %110, %111 : vector<2x128xf32>
    %113 = math.tanh %107 : vector<2x128xf32>
    %114 = vector.extract_strided_slice %112 {offsets = [0, 0], sizes = [2, 32], strides = [1, 1]} : vector<2x128xf32> to vector<2x32xf32>
    %115 = vector.extract_strided_slice %112 {offsets = [0, 32], sizes = [2, 32], strides = [1, 1]} : vector<2x128xf32> to vector<2x32xf32>
    %116 = vector.extract_strided_slice %113 {offsets = [0, 64], sizes = [2, 32], strides = [1, 1]} : vector<2x128xf32> to vector<2x32xf32>
    %117 = vector.extract_strided_slice %112 {offsets = [0, 96], sizes = [2, 32], strides = [1, 1]} : vector<2x128xf32> to vector<2x32xf32>
    %118 = arith.mulf %115, %96 : vector<2x32xf32>
    %119 = arith.mulf %114, %116 : vector<2x32xf32>
    %120 = arith.addf %118, %119 : vector<2x32xf32>
    %121 = math.tanh %120 : vector<2x32xf32>
    %122 = arith.mulf %117, %121 : vector<2x32xf32>
    %c0_38 = arith.constant 0 : index
    %c5 = arith.constant 5 : index
    %123 = memref.load %arg0[%c0_38, %c5] : memref<2x8xi32, #tpu.memory_space<smem>>
    %124 = arith.index_cast %123 : i32 to index
    %c0_39 = arith.constant 0 : index
    %125 = vector.load %arg1[%124, %c0_39] : memref<50x128xf32, #tpu.memory_space<vmem>>, vector<1x128xf32>
    %c1_40 = arith.constant 1 : index
    %c5_41 = arith.constant 5 : index
    %126 = memref.load %arg0[%c1_40, %c5_41] : memref<2x8xi32, #tpu.memory_space<smem>>
    %127 = arith.index_cast %126 : i32 to index
    %c0_42 = arith.constant 0 : index
    %128 = vector.load %arg1[%127, %c0_42] : memref<50x128xf32, #tpu.memory_space<vmem>>, vector<1x128xf32>
    %129 = tpu.concatenate %125, %128 in 0 : vector<1x128xf32>, vector<1x128xf32> -> vector<2x128xf32>
    %cst_43 = arith.constant dense<0.000000e+00> : vector<2x128xf32>
    %130 = tpu.matmul %122, %2, %cst_43 {dimension_numbers = #tpu.dot_dimension_numbers<[1], [0], [0], [1], [0, 0, 1, 1], [], []>} : vector<2x32xf32>, vector<32x128xf32>, vector<2x128xf32> -> vector<2x128xf32>
    %131 = arith.addf %129, %130 : vector<2x128xf32>
    %132 = arith.negf %131 : vector<2x128xf32>
    %133 = math.exp %132 : vector<2x128xf32>
    %cst_44 = arith.constant 1.000000e+00 : f32
    %134 = vector.broadcast %cst_44 : f32 to vector<2x128xf32>
    %135 = arith.addf %134, %133 : vector<2x128xf32>
    %136 = arith.divf %134, %135 : vector<2x128xf32>
    %137 = math.tanh %131 : vector<2x128xf32>
    %138 = vector.extract_strided_slice %136 {offsets = [0, 0], sizes = [2, 32], strides = [1, 1]} : vector<2x128xf32> to vector<2x32xf32>
    %139 = vector.extract_strided_slice %136 {offsets = [0, 32], sizes = [2, 32], strides = [1, 1]} : vector<2x128xf32> to vector<2x32xf32>
    %140 = vector.extract_strided_slice %137 {offsets = [0, 64], sizes = [2, 32], strides = [1, 1]} : vector<2x128xf32> to vector<2x32xf32>
    %141 = vector.extract_strided_slice %136 {offsets = [0, 96], sizes = [2, 32], strides = [1, 1]} : vector<2x128xf32> to vector<2x32xf32>
    %142 = arith.mulf %139, %120 : vector<2x32xf32>
    %143 = arith.mulf %138, %140 : vector<2x32xf32>
    %144 = arith.addf %142, %143 : vector<2x32xf32>
    %145 = math.tanh %144 : vector<2x32xf32>
    %146 = arith.mulf %141, %145 : vector<2x32xf32>
    %c0_45 = arith.constant 0 : index
    %c6 = arith.constant 6 : index
    %147 = memref.load %arg0[%c0_45, %c6] : memref<2x8xi32, #tpu.memory_space<smem>>
    %148 = arith.index_cast %147 : i32 to index
    %c0_46 = arith.constant 0 : index
    %149 = vector.load %arg1[%148, %c0_46] : memref<50x128xf32, #tpu.memory_space<vmem>>, vector<1x128xf32>
    %c1_47 = arith.constant 1 : index
    %c6_48 = arith.constant 6 : index
    %150 = memref.load %arg0[%c1_47, %c6_48] : memref<2x8xi32, #tpu.memory_space<smem>>
    %151 = arith.index_cast %150 : i32 to index
    %c0_49 = arith.constant 0 : index
    %152 = vector.load %arg1[%151, %c0_49] : memref<50x128xf32, #tpu.memory_space<vmem>>, vector<1x128xf32>
    %153 = tpu.concatenate %149, %152 in 0 : vector<1x128xf32>, vector<1x128xf32> -> vector<2x128xf32>
    %cst_50 = arith.constant dense<0.000000e+00> : vector<2x128xf32>
    %154 = tpu.matmul %146, %2, %cst_50 {dimension_numbers = #tpu.dot_dimension_numbers<[1], [0], [0], [1], [0, 0, 1, 1], [], []>} : vector<2x32xf32>, vector<32x128xf32>, vector<2x128xf32> -> vector<2x128xf32>
    %155 = arith.addf %153, %154 : vector<2x128xf32>
    %156 = arith.negf %155 : vector<2x128xf32>
    %157 = math.exp %156 : vector<2x128xf32>
    %cst_51 = arith.constant 1.000000e+00 : f32
    %158 = vector.broadcast %cst_51 : f32 to vector<2x128xf32>
    %159 = arith.addf %158, %157 : vector<2x128xf32>
    %160 = arith.divf %158, %159 : vector<2x128xf32>
    %161 = math.tanh %155 : vector<2x128xf32>
    %162 = vector.extract_strided_slice %160 {offsets = [0, 0], sizes = [2, 32], strides = [1, 1]} : vector<2x128xf32> to vector<2x32xf32>
    %163 = vector.extract_strided_slice %160 {offsets = [0, 32], sizes = [2, 32], strides = [1, 1]} : vector<2x128xf32> to vector<2x32xf32>
    %164 = vector.extract_strided_slice %161 {offsets = [0, 64], sizes = [2, 32], strides = [1, 1]} : vector<2x128xf32> to vector<2x32xf32>
    %165 = vector.extract_strided_slice %160 {offsets = [0, 96], sizes = [2, 32], strides = [1, 1]} : vector<2x128xf32> to vector<2x32xf32>
    %166 = arith.mulf %163, %144 : vector<2x32xf32>
    %167 = arith.mulf %162, %164 : vector<2x32xf32>
    %168 = arith.addf %166, %167 : vector<2x32xf32>
    %169 = math.tanh %168 : vector<2x32xf32>
    %170 = arith.mulf %165, %169 : vector<2x32xf32>
    %c0_52 = arith.constant 0 : index
    %c7 = arith.constant 7 : index
    %171 = memref.load %arg0[%c0_52, %c7] : memref<2x8xi32, #tpu.memory_space<smem>>
    %172 = arith.index_cast %171 : i32 to index
    %c0_53 = arith.constant 0 : index
    %173 = vector.load %arg1[%172, %c0_53] : memref<50x128xf32, #tpu.memory_space<vmem>>, vector<1x128xf32>
    %c1_54 = arith.constant 1 : index
    %c7_55 = arith.constant 7 : index
    %174 = memref.load %arg0[%c1_54, %c7_55] : memref<2x8xi32, #tpu.memory_space<smem>>
    %175 = arith.index_cast %174 : i32 to index
    %c0_56 = arith.constant 0 : index
    %176 = vector.load %arg1[%175, %c0_56] : memref<50x128xf32, #tpu.memory_space<vmem>>, vector<1x128xf32>
    %177 = tpu.concatenate %173, %176 in 0 : vector<1x128xf32>, vector<1x128xf32> -> vector<2x128xf32>
    %cst_57 = arith.constant dense<0.000000e+00> : vector<2x128xf32>
    %178 = tpu.matmul %170, %2, %cst_57 {dimension_numbers = #tpu.dot_dimension_numbers<[1], [0], [0], [1], [0, 0, 1, 1], [], []>} : vector<2x32xf32>, vector<32x128xf32>, vector<2x128xf32> -> vector<2x128xf32>
    %179 = arith.addf %177, %178 : vector<2x128xf32>
    %180 = arith.negf %179 : vector<2x128xf32>
    %181 = math.exp %180 : vector<2x128xf32>
    %cst_58 = arith.constant 1.000000e+00 : f32
    %182 = vector.broadcast %cst_58 : f32 to vector<2x128xf32>
    %183 = arith.addf %182, %181 : vector<2x128xf32>
    %184 = arith.divf %182, %183 : vector<2x128xf32>
    %185 = math.tanh %179 : vector<2x128xf32>
    %186 = vector.extract_strided_slice %184 {offsets = [0, 0], sizes = [2, 32], strides = [1, 1]} : vector<2x128xf32> to vector<2x32xf32>
    %187 = vector.extract_strided_slice %184 {offsets = [0, 32], sizes = [2, 32], strides = [1, 1]} : vector<2x128xf32> to vector<2x32xf32>
    %188 = vector.extract_strided_slice %185 {offsets = [0, 64], sizes = [2, 32], strides = [1, 1]} : vector<2x128xf32> to vector<2x32xf32>
    %189 = vector.extract_strided_slice %184 {offsets = [0, 96], sizes = [2, 32], strides = [1, 1]} : vector<2x128xf32> to vector<2x32xf32>
    %190 = arith.mulf %187, %168 : vector<2x32xf32>
    %191 = arith.mulf %186, %188 : vector<2x32xf32>
    %192 = arith.addf %190, %191 : vector<2x32xf32>
    %193 = math.tanh %192 : vector<2x32xf32>
    %194 = arith.mulf %189, %193 : vector<2x32xf32>
    %195 = tpu.concatenate %26, %50, %74, %98, %122, %146, %170, %194 in 0 : vector<2x32xf32>, vector<2x32xf32>, vector<2x32xf32>, vector<2x32xf32>, vector<2x32xf32>, vector<2x32xf32>, vector<2x32xf32>, vector<2x32xf32> -> vector<16x32xf32>
    %c0_59 = arith.constant 0 : index
    %c0_60 = arith.constant 0 : index
    %196 = vector.load %arg3[%c0_59, %c0_60] : memref<32x128xf32, #tpu.memory_space<vmem>>, vector<32x128xf32>
    %cst_61 = arith.constant dense<0.000000e+00> : vector<16x128xf32>
    %197 = tpu.matmul %195, %196, %cst_61 {dimension_numbers = #tpu.dot_dimension_numbers<[1], [0], [0], [1], [0, 0, 1, 1], [], []>} : vector<16x32xf32>, vector<32x128xf32>, vector<16x128xf32> -> vector<16x128xf32>
    %c0_62 = arith.constant 0 : index
    %c0_63 = arith.constant 0 : index
    %198 = vector.load %arg5[%c0_62, %c0_63] : memref<1x128xf32, #tpu.memory_space<vmem>>, vector<1x128xf32>
    %199 = vector.broadcast %198 : vector<1x128xf32> to vector<16x128xf32>
    %200 = arith.addf %197, %199 : vector<16x128xf32>
    %c0_64 = arith.constant 0 : index
    %c0_65 = arith.constant 0 : index
    %201 = vector.load %arg4[%c0_64, %c0_65] : memref<32x128xf32, #tpu.memory_space<vmem>>, vector<32x128xf32>
    %202 = vector.extract_strided_slice %200 {offsets = [0, 0], sizes = [2, 128], strides = [1, 1]} : vector<16x128xf32> to vector<2x128xf32>
    %cst_66 = arith.constant dense<0.000000e+00> : vector<2x128xf32>
    %203 = tpu.matmul %194, %201, %cst_66 {dimension_numbers = #tpu.dot_dimension_numbers<[1], [0], [0], [1], [0, 0, 1, 1], [], []>} : vector<2x32xf32>, vector<32x128xf32>, vector<2x128xf32> -> vector<2x128xf32>
    %204 = arith.addf %202, %203 : vector<2x128xf32>
    %205 = arith.negf %204 : vector<2x128xf32>
    %206 = math.exp %205 : vector<2x128xf32>
    %cst_67 = arith.constant 1.000000e+00 : f32
    %207 = vector.broadcast %cst_67 : f32 to vector<2x128xf32>
    %208 = arith.addf %207, %206 : vector<2x128xf32>
    %209 = arith.divf %207, %208 : vector<2x128xf32>
    %210 = math.tanh %204 : vector<2x128xf32>
    %211 = vector.extract_strided_slice %209 {offsets = [0, 0], sizes = [2, 32], strides = [1, 1]} : vector<2x128xf32> to vector<2x32xf32>
    %212 = vector.extract_strided_slice %209 {offsets = [0, 32], sizes = [2, 32], strides = [1, 1]} : vector<2x128xf32> to vector<2x32xf32>
    %213 = vector.extract_strided_slice %210 {offsets = [0, 64], sizes = [2, 32], strides = [1, 1]} : vector<2x128xf32> to vector<2x32xf32>
    %214 = vector.extract_strided_slice %209 {offsets = [0, 96], sizes = [2, 32], strides = [1, 1]} : vector<2x128xf32> to vector<2x32xf32>
    %215 = arith.mulf %212, %192 : vector<2x32xf32>
    %216 = arith.mulf %211, %213 : vector<2x32xf32>
    %217 = arith.addf %215, %216 : vector<2x32xf32>
    %218 = math.tanh %217 : vector<2x32xf32>
    %219 = arith.mulf %214, %218 : vector<2x32xf32>
    %220 = vector.extract_strided_slice %200 {offsets = [2, 0], sizes = [2, 128], strides = [1, 1]} : vector<16x128xf32> to vector<2x128xf32>
    %cst_68 = arith.constant dense<0.000000e+00> : vector<2x128xf32>
    %221 = tpu.matmul %219, %201, %cst_68 {dimension_numbers = #tpu.dot_dimension_numbers<[1], [0], [0], [1], [0, 0, 1, 1], [], []>} : vector<2x32xf32>, vector<32x128xf32>, vector<2x128xf32> -> vector<2x128xf32>
    %222 = arith.addf %220, %221 : vector<2x128xf32>
    %223 = arith.negf %222 : vector<2x128xf32>
    %224 = math.exp %223 : vector<2x128xf32>
    %cst_69 = arith.constant 1.000000e+00 : f32
    %225 = vector.broadcast %cst_69 : f32 to vector<2x128xf32>
    %226 = arith.addf %225, %224 : vector<2x128xf32>
    %227 = arith.divf %225, %226 : vector<2x128xf32>
    %228 = math.tanh %222 : vector<2x128xf32>
    %229 = vector.extract_strided_slice %227 {offsets = [0, 0], sizes = [2, 32], strides = [1, 1]} : vector<2x128xf32> to vector<2x32xf32>
    %230 = vector.extract_strided_slice %227 {offsets = [0, 32], sizes = [2, 32], strides = [1, 1]} : vector<2x128xf32> to vector<2x32xf32>
    %231 = vector.extract_strided_slice %228 {offsets = [0, 64], sizes = [2, 32], strides = [1, 1]} : vector<2x128xf32> to vector<2x32xf32>
    %232 = vector.extract_strided_slice %227 {offsets = [0, 96], sizes = [2, 32], strides = [1, 1]} : vector<2x128xf32> to vector<2x32xf32>
    %233 = arith.mulf %230, %217 : vector<2x32xf32>
    %234 = arith.mulf %229, %231 : vector<2x32xf32>
    %235 = arith.addf %233, %234 : vector<2x32xf32>
    %236 = math.tanh %235 : vector<2x32xf32>
    %237 = arith.mulf %232, %236 : vector<2x32xf32>
    %238 = vector.extract_strided_slice %200 {offsets = [4, 0], sizes = [2, 128], strides = [1, 1]} : vector<16x128xf32> to vector<2x128xf32>
    %cst_70 = arith.constant dense<0.000000e+00> : vector<2x128xf32>
    %239 = tpu.matmul %237, %201, %cst_70 {dimension_numbers = #tpu.dot_dimension_numbers<[1], [0], [0], [1], [0, 0, 1, 1], [], []>} : vector<2x32xf32>, vector<32x128xf32>, vector<2x128xf32> -> vector<2x128xf32>
    %240 = arith.addf %238, %239 : vector<2x128xf32>
    %241 = arith.negf %240 : vector<2x128xf32>
    %242 = math.exp %241 : vector<2x128xf32>
    %cst_71 = arith.constant 1.000000e+00 : f32
    %243 = vector.broadcast %cst_71 : f32 to vector<2x128xf32>
    %244 = arith.addf %243, %242 : vector<2x128xf32>
    %245 = arith.divf %243, %244 : vector<2x128xf32>
    %246 = math.tanh %240 : vector<2x128xf32>
    %247 = vector.extract_strided_slice %245 {offsets = [0, 0], sizes = [2, 32], strides = [1, 1]} : vector<2x128xf32> to vector<2x32xf32>
    %248 = vector.extract_strided_slice %245 {offsets = [0, 32], sizes = [2, 32], strides = [1, 1]} : vector<2x128xf32> to vector<2x32xf32>
    %249 = vector.extract_strided_slice %246 {offsets = [0, 64], sizes = [2, 32], strides = [1, 1]} : vector<2x128xf32> to vector<2x32xf32>
    %250 = vector.extract_strided_slice %245 {offsets = [0, 96], sizes = [2, 32], strides = [1, 1]} : vector<2x128xf32> to vector<2x32xf32>
    %251 = arith.mulf %248, %235 : vector<2x32xf32>
    %252 = arith.mulf %247, %249 : vector<2x32xf32>
    %253 = arith.addf %251, %252 : vector<2x32xf32>
    %254 = math.tanh %253 : vector<2x32xf32>
    %255 = arith.mulf %250, %254 : vector<2x32xf32>
    %256 = vector.extract_strided_slice %200 {offsets = [6, 0], sizes = [2, 128], strides = [1, 1]} : vector<16x128xf32> to vector<2x128xf32>
    %cst_72 = arith.constant dense<0.000000e+00> : vector<2x128xf32>
    %257 = tpu.matmul %255, %201, %cst_72 {dimension_numbers = #tpu.dot_dimension_numbers<[1], [0], [0], [1], [0, 0, 1, 1], [], []>} : vector<2x32xf32>, vector<32x128xf32>, vector<2x128xf32> -> vector<2x128xf32>
    %258 = arith.addf %256, %257 : vector<2x128xf32>
    %259 = arith.negf %258 : vector<2x128xf32>
    %260 = math.exp %259 : vector<2x128xf32>
    %cst_73 = arith.constant 1.000000e+00 : f32
    %261 = vector.broadcast %cst_73 : f32 to vector<2x128xf32>
    %262 = arith.addf %261, %260 : vector<2x128xf32>
    %263 = arith.divf %261, %262 : vector<2x128xf32>
    %264 = math.tanh %258 : vector<2x128xf32>
    %265 = vector.extract_strided_slice %263 {offsets = [0, 0], sizes = [2, 32], strides = [1, 1]} : vector<2x128xf32> to vector<2x32xf32>
    %266 = vector.extract_strided_slice %263 {offsets = [0, 32], sizes = [2, 32], strides = [1, 1]} : vector<2x128xf32> to vector<2x32xf32>
    %267 = vector.extract_strided_slice %264 {offsets = [0, 64], sizes = [2, 32], strides = [1, 1]} : vector<2x128xf32> to vector<2x32xf32>
    %268 = vector.extract_strided_slice %263 {offsets = [0, 96], sizes = [2, 32], strides = [1, 1]} : vector<2x128xf32> to vector<2x32xf32>
    %269 = arith.mulf %266, %253 : vector<2x32xf32>
    %270 = arith.mulf %265, %267 : vector<2x32xf32>
    %271 = arith.addf %269, %270 : vector<2x32xf32>
    %272 = math.tanh %271 : vector<2x32xf32>
    %273 = arith.mulf %268, %272 : vector<2x32xf32>
    %274 = vector.extract_strided_slice %200 {offsets = [8, 0], sizes = [2, 128], strides = [1, 1]} : vector<16x128xf32> to vector<2x128xf32>
    %cst_74 = arith.constant dense<0.000000e+00> : vector<2x128xf32>
    %275 = tpu.matmul %273, %201, %cst_74 {dimension_numbers = #tpu.dot_dimension_numbers<[1], [0], [0], [1], [0, 0, 1, 1], [], []>} : vector<2x32xf32>, vector<32x128xf32>, vector<2x128xf32> -> vector<2x128xf32>
    %276 = arith.addf %274, %275 : vector<2x128xf32>
    %277 = arith.negf %276 : vector<2x128xf32>
    %278 = math.exp %277 : vector<2x128xf32>
    %cst_75 = arith.constant 1.000000e+00 : f32
    %279 = vector.broadcast %cst_75 : f32 to vector<2x128xf32>
    %280 = arith.addf %279, %278 : vector<2x128xf32>
    %281 = arith.divf %279, %280 : vector<2x128xf32>
    %282 = math.tanh %276 : vector<2x128xf32>
    %283 = vector.extract_strided_slice %281 {offsets = [0, 0], sizes = [2, 32], strides = [1, 1]} : vector<2x128xf32> to vector<2x32xf32>
    %284 = vector.extract_strided_slice %281 {offsets = [0, 32], sizes = [2, 32], strides = [1, 1]} : vector<2x128xf32> to vector<2x32xf32>
    %285 = vector.extract_strided_slice %282 {offsets = [0, 64], sizes = [2, 32], strides = [1, 1]} : vector<2x128xf32> to vector<2x32xf32>
    %286 = vector.extract_strided_slice %281 {offsets = [0, 96], sizes = [2, 32], strides = [1, 1]} : vector<2x128xf32> to vector<2x32xf32>
    %287 = arith.mulf %284, %271 : vector<2x32xf32>
    %288 = arith.mulf %283, %285 : vector<2x32xf32>
    %289 = arith.addf %287, %288 : vector<2x32xf32>
    %290 = math.tanh %289 : vector<2x32xf32>
    %291 = arith.mulf %286, %290 : vector<2x32xf32>
    %292 = vector.extract_strided_slice %200 {offsets = [10, 0], sizes = [2, 128], strides = [1, 1]} : vector<16x128xf32> to vector<2x128xf32>
    %cst_76 = arith.constant dense<0.000000e+00> : vector<2x128xf32>
    %293 = tpu.matmul %291, %201, %cst_76 {dimension_numbers = #tpu.dot_dimension_numbers<[1], [0], [0], [1], [0, 0, 1, 1], [], []>} : vector<2x32xf32>, vector<32x128xf32>, vector<2x128xf32> -> vector<2x128xf32>
    %294 = arith.addf %292, %293 : vector<2x128xf32>
    %295 = arith.negf %294 : vector<2x128xf32>
    %296 = math.exp %295 : vector<2x128xf32>
    %cst_77 = arith.constant 1.000000e+00 : f32
    %297 = vector.broadcast %cst_77 : f32 to vector<2x128xf32>
    %298 = arith.addf %297, %296 : vector<2x128xf32>
    %299 = arith.divf %297, %298 : vector<2x128xf32>
    %300 = math.tanh %294 : vector<2x128xf32>
    %301 = vector.extract_strided_slice %299 {offsets = [0, 0], sizes = [2, 32], strides = [1, 1]} : vector<2x128xf32> to vector<2x32xf32>
    %302 = vector.extract_strided_slice %299 {offsets = [0, 32], sizes = [2, 32], strides = [1, 1]} : vector<2x128xf32> to vector<2x32xf32>
    %303 = vector.extract_strided_slice %300 {offsets = [0, 64], sizes = [2, 32], strides = [1, 1]} : vector<2x128xf32> to vector<2x32xf32>
    %304 = vector.extract_strided_slice %299 {offsets = [0, 96], sizes = [2, 32], strides = [1, 1]} : vector<2x128xf32> to vector<2x32xf32>
    %305 = arith.mulf %302, %289 : vector<2x32xf32>
    %306 = arith.mulf %301, %303 : vector<2x32xf32>
    %307 = arith.addf %305, %306 : vector<2x32xf32>
    %308 = math.tanh %307 : vector<2x32xf32>
    %309 = arith.mulf %304, %308 : vector<2x32xf32>
    %310 = vector.extract_strided_slice %200 {offsets = [12, 0], sizes = [2, 128], strides = [1, 1]} : vector<16x128xf32> to vector<2x128xf32>
    %cst_78 = arith.constant dense<0.000000e+00> : vector<2x128xf32>
    %311 = tpu.matmul %309, %201, %cst_78 {dimension_numbers = #tpu.dot_dimension_numbers<[1], [0], [0], [1], [0, 0, 1, 1], [], []>} : vector<2x32xf32>, vector<32x128xf32>, vector<2x128xf32> -> vector<2x128xf32>
    %312 = arith.addf %310, %311 : vector<2x128xf32>
    %313 = arith.negf %312 : vector<2x128xf32>
    %314 = math.exp %313 : vector<2x128xf32>
    %cst_79 = arith.constant 1.000000e+00 : f32
    %315 = vector.broadcast %cst_79 : f32 to vector<2x128xf32>
    %316 = arith.addf %315, %314 : vector<2x128xf32>
    %317 = arith.divf %315, %316 : vector<2x128xf32>
    %318 = math.tanh %312 : vector<2x128xf32>
    %319 = vector.extract_strided_slice %317 {offsets = [0, 0], sizes = [2, 32], strides = [1, 1]} : vector<2x128xf32> to vector<2x32xf32>
    %320 = vector.extract_strided_slice %317 {offsets = [0, 32], sizes = [2, 32], strides = [1, 1]} : vector<2x128xf32> to vector<2x32xf32>
    %321 = vector.extract_strided_slice %318 {offsets = [0, 64], sizes = [2, 32], strides = [1, 1]} : vector<2x128xf32> to vector<2x32xf32>
    %322 = vector.extract_strided_slice %317 {offsets = [0, 96], sizes = [2, 32], strides = [1, 1]} : vector<2x128xf32> to vector<2x32xf32>
    %323 = arith.mulf %320, %307 : vector<2x32xf32>
    %324 = arith.mulf %319, %321 : vector<2x32xf32>
    %325 = arith.addf %323, %324 : vector<2x32xf32>
    %326 = math.tanh %325 : vector<2x32xf32>
    %327 = arith.mulf %322, %326 : vector<2x32xf32>
    %328 = vector.extract_strided_slice %200 {offsets = [14, 0], sizes = [2, 128], strides = [1, 1]} : vector<16x128xf32> to vector<2x128xf32>
    %cst_80 = arith.constant dense<0.000000e+00> : vector<2x128xf32>
    %329 = tpu.matmul %327, %201, %cst_80 {dimension_numbers = #tpu.dot_dimension_numbers<[1], [0], [0], [1], [0, 0, 1, 1], [], []>} : vector<2x32xf32>, vector<32x128xf32>, vector<2x128xf32> -> vector<2x128xf32>
    %330 = arith.addf %328, %329 : vector<2x128xf32>
    %331 = arith.negf %330 : vector<2x128xf32>
    %332 = math.exp %331 : vector<2x128xf32>
    %cst_81 = arith.constant 1.000000e+00 : f32
    %333 = vector.broadcast %cst_81 : f32 to vector<2x128xf32>
    %334 = arith.addf %333, %332 : vector<2x128xf32>
    %335 = arith.divf %333, %334 : vector<2x128xf32>
    %336 = math.tanh %330 : vector<2x128xf32>
    %337 = vector.extract_strided_slice %335 {offsets = [0, 0], sizes = [2, 32], strides = [1, 1]} : vector<2x128xf32> to vector<2x32xf32>
    %338 = vector.extract_strided_slice %335 {offsets = [0, 32], sizes = [2, 32], strides = [1, 1]} : vector<2x128xf32> to vector<2x32xf32>
    %339 = vector.extract_strided_slice %336 {offsets = [0, 64], sizes = [2, 32], strides = [1, 1]} : vector<2x128xf32> to vector<2x32xf32>
    %340 = vector.extract_strided_slice %335 {offsets = [0, 96], sizes = [2, 32], strides = [1, 1]} : vector<2x128xf32> to vector<2x32xf32>
    %341 = arith.mulf %338, %325 : vector<2x32xf32>
    %342 = arith.mulf %337, %339 : vector<2x32xf32>
    %343 = arith.addf %341, %342 : vector<2x32xf32>
    %344 = math.tanh %343 : vector<2x32xf32>
    %345 = arith.mulf %340, %344 : vector<2x32xf32>
    %c0_82 = arith.constant 0 : index
    %c0_83 = arith.constant 0 : index
    %346 = vector.load %arg6[%c0_82, %c0_83] : memref<32x32xf32, #tpu.memory_space<vmem>>, vector<32x32xf32>
    %cst_84 = arith.constant dense<0.000000e+00> : vector<2x32xf32>
    %347 = tpu.matmul %345, %346, %cst_84 {dimension_numbers = #tpu.dot_dimension_numbers<[1], [0], [0], [1], [0, 0, 1, 1], [], []>} : vector<2x32xf32>, vector<32x32xf32>, vector<2x32xf32> -> vector<2x32xf32>
    %c0_85 = arith.constant 0 : index
    %c0_86 = arith.constant 0 : index
    %348 = vector.load %arg7[%c0_85, %c0_86] : memref<1x32xf32, #tpu.memory_space<vmem>>, vector<1x32xf32>
    %349 = vector.broadcast %348 : vector<1x32xf32> to vector<2x32xf32>
    %350 = arith.addf %347, %349 : vector<2x32xf32>
    %cst_87 = arith.constant 0.000000e+00 : f32
    %351 = vector.broadcast %cst_87 : f32 to vector<2x32xf32>
    %352 = arith.maximumf %350, %351 : vector<2x32xf32>
    %c0_88 = arith.constant 0 : index
    %c0_89 = arith.constant 0 : index
    %353 = vector.load %arg8[%c0_88, %c0_89] : memref<32x1xf32, #tpu.memory_space<vmem>>, vector<32x1xf32>
    %cst_90 = arith.constant dense<0.000000e+00> : vector<2x1xf32>
    %354 = tpu.matmul %352, %353, %cst_90 {dimension_numbers = #tpu.dot_dimension_numbers<[1], [0], [0], [1], [0, 0, 1, 1], [], []>} : vector<2x32xf32>, vector<32x1xf32>, vector<2x1xf32> -> vector<2x1xf32>
    %c0_91 = arith.constant 0 : index
    %c0_92 = arith.constant 0 : index
    %355 = vector.load %arg9[%c0_91, %c0_92] : memref<1x1xf32, #tpu.memory_space<vmem>>, vector<1x1xf32>
    %356 = vector.broadcast %355 : vector<1x1xf32> to vector<2x1xf32>
    %357 = arith.addf %354, %356 : vector<2x1xf32>
    %c0_93 = arith.constant 0 : index
    %c0_94 = arith.constant 0 : index
    %358 = vector.load %arg10[%c0_93, %c0_94] : memref<2x1xf32, #tpu.memory_space<vmem>>, vector<2x1xf32>
    tpu.vector_store %arg10[%c0_93, %c0_94], %357 {strides = array<i32>} : memref<2x1xf32, #tpu.memory_space<vmem>>, vector<2x1xf32>,
    return
  }
}

</mosaic_0001>

<bundles_post_ra>
// kernel: tpu_custom_call.1
= control target key start
LH: loop header
LB: loop body
LE: loop exit
PB: predicated region body
PF: predicated region fallthrough
CT: control target
= control target key end

     0   :  { %s3286_s0 = inlined_call_operand.vmem [shape: s32[2,8], index: 0, kind: input, shape index: {}]   ;;  %s3287_s1 = inlined_call_operand.hbm [shape: f32[50,128], index: 1, kind: input, shape index: {}]   ;;  %s3288_s2 = inlined_call_operand.vmem [shape: f32[32,128], index: 2, kind: input, shape index: {}]   ;;  %s3289_s3 = inlined_call_operand.hbm [shape: f32[32,128], index: 3, kind: input, shape index: {}]   ;;  %s3290_s4 = inlined_call_operand.hbm [shape: f32[32,128], index: 4, kind: input, shape index: {}]   ;;  %s3291_s5 = inlined_call_operand.vmem [shape: f32[1,128], index: 5, kind: input, shape index: {}]   ;;  %s3292_s6 = inlined_call_operand.hbm [shape: f32[32,32], index: 6, kind: input, shape index: {}]   ;;  %s3293_s7 = inlined_call_operand.vmem [shape: f32[1,32], index: 7, kind: input, shape index: {}]   ;;  %s3294_s8 = inlined_call_operand.vmem [shape: f32[32,1], index: 8, kind: input, shape index: {}]   ;;  %s3295_s9 = inlined_call_operand.<no memory space> [shape: f32[1,1], index: 9, kind: input, shape index: {}]   ;;  %s3296_s10 = inlined_call_operand.vmem [shape: f32[2,1], index: 10, kind: output, shape index: {}]  }
   0x1   :  { %v15_v0 = vstv %s3295_s9 }
   0x2   :  { %16 = vst [vmem:[#allocation2] sm:$0x1] %v15_v0 }
   0x3   :  { %17 = vsyncpa [#allocation5], 0 }
   0x4   :  { %18 = vsyncpa [#allocation4], 0 }
   0x5   :  { %19 = vsyncpa [#allocation8], 0 }
   0x6   :  { %20 = vsyncpa [#allocation11], 0  ;;  %s27_s17 = sshll.u32 %s3286_s0, 4  ;;  %s2874_s18 = smov [#allocation7]   ;;  %s28_s17 = int_to_ptr.vmem [resolvable:$true] %s27_s17 }
   0x7   :  { %s50_s19 = sshll.u32 %s2874_s18, 4  ;;  %s2766_s22 = scalar_lea.hbm %s3289_s3, 512  ;;  %s51_s19 = int_to_ptr.vmem [resolvable:$true] %s50_s19 }
   0x8   :  { %p2767_p0 = scmp.ne.s32.totalorder %s3289_s3, %s2766_s22  ;;  %p2770_p1 = scmp.lt.u32.totalorder %s2766_s22, %s3289_s3 }
   0xa   :  { %p2772_p2 = pnand %p2770_p1, %p2767_p0 }
   0xc   :  { %2775 = shalt.err (!%p2772_p2)
}
   0xd   :  { %s2776_s26 = scalar_lea.vmem %s51_s19, 512  ;;  %p2781_p4 = scmp.lt.s32.totalorder %s51_s19, %s51_s19 }
   0xe   :  { %p2777_p3 = scmp.ne.s32.totalorder %s51_s19, %s2776_s26  ;;  %p2782_p5 = scmp.lt.s32.totalorder %s2776_s26, %s2776_s26 }
  0x10   :  { %p2783_p6 = por %p2782_p5, %p2781_p4 }
  0x12   :  { %p2784_p7 = pnand %p2783_p6, %p2777_p3 }
  0x14   :  { %2787 = shalt.err (!%p2784_p7)
}
  0x15   :  { %s2875_s0 = smov 128   ;;  %s2876_s27 = smov 8  }
  0x16   :  { %56 = dma.hbm_to_vmem [thread:$0]  %s3289_s3, 512, %s51_s19, [#allocation8], %s2875_s0, %s2875_s0, %s2876_s27  }
  0x17   :  { %s2788_s30 = scalar_lea.vmem %s28_s17, 32  ;;  %p2793_p9 = scmp.lt.s32.totalorder %s28_s17, %s28_s17 }
  0x18   :  { %p2789_p8 = scmp.ne.s32.totalorder %s28_s17, %s2788_s30  ;;  %p2794_p10 = scmp.lt.s32.totalorder %s2788_s30, %s2788_s30 }
  0x1a   :  { %p2795_p11 = por %p2794_p10, %p2793_p9 }
  0x1c   :  { %p2796_p12 = pnand %p2795_p11, %p2789_p8 }
  0x1e   :  { %2799 = shalt.err (!%p2796_p12)
}
  0x1f   :  { %s2877_s11 = smov [#allocation3]   ;;  %s2878_s12 = smov [#allocation6]  }
  0x20   :  { %30 = dma.vmem_to_smem %s28_s17, 32, %s2877_s11, [#allocation5]  }
  0x21   :  { %s36_s13 = sshll.u32 %s2878_s12, 4  ;;  %s2879_s14 = smov [#allocation9]   ;;  %s37_s13 = int_to_ptr.vmem [resolvable:$true] %s36_s13 }
  0x22   :  { %s62_s15 = sshll.u32 %s2879_s14, 4  ;;  %s2800_s3 = scalar_lea.hbm %s3287_s1, 896  ;;  %s2962_s15 = int_to_ptr.vmem [resolvable:$true] %s62_s15 }
  0x23   :  { %p2801_p13 = scmp.ne.s32.totalorder %s3287_s1, %s2800_s3  ;;  %p2804_p0 = scmp.lt.u32.totalorder %s2800_s3, %s3287_s1 }
  0x25   :  { %p2806_p1 = pnand %p2804_p0, %p2801_p13 }
  0x27   :  { %2809 = shalt.err (!%p2806_p1)
}
  0x28   :  { %s2810_s17 = scalar_lea.vmem %s37_s13, 896  ;;  %p2815_p3 = scmp.lt.s32.totalorder %s37_s13, %s37_s13 }
  0x29   :  { %p2811_p2 = scmp.ne.s32.totalorder %s37_s13, %s2810_s17  ;;  %p2816_p4 = scmp.lt.s32.totalorder %s2810_s17, %s2810_s17 }
  0x2b   :  { %p2817_p5 = por %p2816_p4, %p2815_p3 }
  0x2d   :  { %p2818_p6 = pnand %p2817_p5, %p2811_p2 }
  0x2f   :  { %2821 = shalt.err (!%p2818_p6)
}
  0x30   :  { %42 = dma.hbm_to_vmem [thread:$0]  %s3287_s1, 896, %s37_s13, [#allocation4], %s2875_s0, %s2875_s0, %s2876_s27  }
  0x31   :  { %s2822_s26 = scalar_lea.hbm %s3290_s4, 512 }
  0x32   :  { %p2823_p7 = scmp.ne.s32.totalorder %s3290_s4, %s2822_s26  ;;  %p2826_p8 = scmp.lt.u32.totalorder %s2822_s26, %s3290_s4 }
  0x34   :  { %p2828_p9 = pnand %p2826_p8, %p2823_p7 }
  0x36   :  { %2831 = shalt.err (!%p2828_p9)
}
  0x37   :  { %s2832_s12 = scalar_lea.vmem %s2962_s15, 512  ;;  %p2837_p11 = scmp.lt.s32.totalorder %s2962_s15, %s2962_s15 }
  0x38   :  { %p2833_p10 = scmp.ne.s32.totalorder %s2962_s15, %s2832_s12  ;;  %p2838_p12 = scmp.lt.s32.totalorder %s2832_s12, %s2832_s12 }
  0x3a   :  { %p2839_p13 = por %p2838_p12, %p2837_p11 }
  0x3c   :  { %p2840_p0 = pnand %p2839_p13, %p2833_p10 }
  0x3e   :  { %2843 = shalt.err (!%p2840_p0)
}
  0x3f   :  { %68 = dma.hbm_to_vmem [thread:$0]  %s3290_s4, 512, %s2962_s15, [#allocation8], %s2875_s0, %s2875_s0, %s2876_s27  }
  0x40   :  { %s2880_s14 = smov [#allocation10]   ;;  %s2844_s19 = scalar_lea.hbm %s3292_s6, 512 }
  0x41   :  { %s76_s16 = sshll.u32 %s2880_s14, 4  ;;  %p2845_p1 = scmp.ne.s32.totalorder %s3292_s6, %s2844_s19  ;;  %s77_s16 = int_to_ptr.vmem [resolvable:$true] %s76_s16 }
  0x42   :  { %p2848_p2 = scmp.lt.u32.totalorder %s2844_s19, %s3292_s6 }
  0x44   :  { %p2850_p3 = pnand %p2848_p2, %p2845_p1 }
  0x46   :  { %2853 = shalt.err (!%p2850_p3)
}
  0x47   :  { %s2854_s23 = scalar_lea.vmem %s77_s16, 512  ;;  %p2859_p5 = scmp.lt.s32.totalorder %s77_s16, %s77_s16 }
  0x48   :  { %p2855_p4 = scmp.ne.s32.totalorder %s77_s16, %s2854_s23  ;;  %p2860_p6 = scmp.lt.s32.totalorder %s2854_s23, %s2854_s23 }
  0x4a   :  { %p2861_p7 = por %p2860_p6, %p2859_p5 }
  0x4c   :  { %p2862_p8 = pnand %p2861_p7, %p2855_p4 }
  0x4e   :  { %2865 = shalt.err (!%p2862_p8)
}
  0x4f   :  { %82 = dma.hbm_to_vmem [thread:$0]  %s3292_s6, 512, %s77_s16, [#allocation11], %s2875_s0, %s2875_s0, %s2876_s27  }
  0x50   :  { %2866 = dma.done.wait [#allocation5], 32  }
  0x51   :  { %2867 = vsyncadd [#allocation5], 4294967264 }
  0x52   :  { %2868 = dma.done.wait [#allocation4], 896  }
  0x53   :  { %2869 = vsyncadd [#allocation4], 4294966400 }
  0x54   :  { %2870 = dma.done.wait [#allocation8], 1024  }
  0x55   :  { %2871 = vsyncadd [#allocation8], 4294966272 }
  0x56   :  { %2872 = dma.done.wait [#allocation11], 512  }
  0x57   :  { %2873 = vsyncadd [#allocation11], 4294966784 }
  0x58   :  { %104 = sfence }
  0x59   :  { %v105_v1 = vld [vmem:[%s3288_s2] sm:$0xff]  ;;  %v106_v2 = vld [vmem:[%s3288_s2 + $0x8] sm:$0xff]  ;;  %v107_v3 = vld [vmem:[%s3288_s2 + $0x10] sm:$0xff]  ;;  %v2881_v4 = vmov 0.0|0.0   ;;  %vm2882_vm0 = vmmov 0   ;;  %v2883_v7 = vmov 0.0  }
  0x5a   :  { %2510 = vmatprep.subr.bf16.mxu0 %v2881_v4  ;;  %v3024_v5 = vpack.c.bf16 %v106_v2, %v105_v1  ;;  %v108_v6 = vld [vmem:[%s3288_s2 + $0x18] sm:$0xff]  ;;  %2309 = vmatprep.mubr.msk.f32.mxu0 %vm2882_vm0, %v2883_v7  ;;  %s2152_s2 = sld [smem:[#allocation3 + $0x80]]  ;;  %vm118_vm1 = vcmask 1040384   ;;  %s2884_s12 = smov 64   ;;  %vm120_vm2 = vcmask 261120   ;;  %vm1002_vm3 = vcmask 1041408  }
  0x5b   :  { %2516 = vmatprep.subr.bf16.mxu1 %v2881_v4  ;;  %2320 = vmatprep.mubr.msk.f32.mxu1 %vm2882_vm0, %v2883_v7  ;;  %v3035_v8 = vpack.c.bf16 %v108_v6, %v107_v3  ;;  %s109_s27 = sld [smem:[#allocation3]]  ;;  %s2885_s1 = smov 32   ;;  %vm1004_vm4 = vcmask 1043456   ;;  %vm1006_vm5 = vcmask 1045504   ;;  %vm2126_vm6 = vcmask 1024  }
  0x5c   :  { %2512 = vmatpush3.bf16.msra.mxu0 %v3024_v5  ;;  %2518 = vmatpush3.bf16.msra.mxu1 %v3024_v5  ;;  %s2155_s13 = sld [smem:[#allocation3 + $0x81]]  ;;  %s2159_s3 = sld [smem:[#allocation3 + $0x82]] }
  0x5d   :  { %2513 = vmatprep.subr.bf16.mxu0 %v2881_v4  ;;  %2519 = vmatprep.subr.bf16.mxu1 %v2881_v4  ;;  %s2154_s14 = sld [smem:[#allocation3 + $0x1]]  ;;  %s2158_s19 = sld [smem:[#allocation3 + $0x2]] }
  0x5e   :  { %s2163_s22 = sld [smem:[#allocation3 + $0x83]]  ;;  %s2167_s15 = sld [smem:[#allocation3 + $0x84]] }
  0x5f   :  { %s2162_s17 = sld [smem:[#allocation3 + $0x3]]  ;;  %s2166_s24 = sld [smem:[#allocation3 + $0x4]] }
  0x60   :  { %2515 = vmatpush3.bf16.msra.mxu0 %v3035_v8  ;;  %2521 = vmatpush3.bf16.msra.mxu1 %v3035_v8  ;;  %s113_s30 = scalar_lea.vmem [#allocation6], %s2152_s2  ;;  %s2171_s26 = sld [smem:[#allocation3 + $0x85]] }
  0x61   :  { %2522 = vmatprep.subr.bf16.mxu0 %v2881_v4  ;;  %2528 = vmatprep.subr.bf16.mxu1 %v2881_v4  ;;  %v114_v9 = vld [vmem:[%s113_s30] sm:$0x1]  ;;  %s110_s11 = scalar_lea.vmem [#allocation6], %s109_s27  ;;  %s2170_s28 = sld [smem:[#allocation3 + $0x5]] }
  0x62   :  { %v116_v10 = vrot.slane %v114_v9, 7  ;;  %v111_v11 = vld [vmem:[%s110_s11] sm:$0x1]  ;;  %s223_s16 = scalar_lea.vmem [#allocation6], %s2155_s13  ;;  %s333_s20 = scalar_lea.vmem [#allocation6], %s2159_s3 }
  0x63   :  { %2310 = vmatmul.mubr.f32.vlgmr.msra.gmra.mrb[0].mxu0 %v2883_v7  ;;  %v224_v30 = vld [vmem:[%s223_s16] sm:$0x1]  ;;  %s220_s18 = scalar_lea.vmem [#allocation6], %s2154_s14  ;;  %s330_s21 = scalar_lea.vmem [#allocation6], %s2158_s19 }
  0x64   :  { %2524 = vmatpush3.bf16.msra.mxu0 %v3024_v5  ;;  %2331 = vmatprep.mubr.msk.f32.mxu0 %vm2882_vm0, %v2883_v7  ;;  %v119_v12 = vsel %vm118_vm1, %v111_v11, %v116_v10  ;;  %v226_v31 = vrot.slane %v224_v30, 7  ;;  %v221_v32 = vld [vmem:[%s220_s18] sm:$0x1]  ;;  %s443_s23 = scalar_lea.vmem [#allocation6], %s2163_s22  ;;  %s553_s9 = scalar_lea.vmem [#allocation6], %s2167_s15 }
  0x65   :  { %2525 = vmatprep.subr.bf16.mxu0 %v2881_v4  ;;  %v334_v51 = vld [vmem:[%s333_s20] sm:$0x1]  ;;  %s440_s4 = scalar_lea.vmem [#allocation6], %s2162_s17  ;;  %s550_s25 = scalar_lea.vmem [#allocation6], %s2166_s24 }
  0x66   :  { %v228_v33 = vsel %vm118_vm1, %v221_v32, %v226_v31  ;;  %v336_v52 = vrot.slane %v334_v51, 7  ;;  %v331_v53 = vld [vmem:[%s330_s21] sm:$0x1]  ;;  %s663_s29 = scalar_lea.vmem [#allocation6], %s2171_s26  ;;  %s2175_s0 = sld [smem:[#allocation3 + $0x86]] }
  0x67   :  { %s660_s6 = scalar_lea.vmem [#allocation6], %s2170_s28  ;;  %s2174_s2 = sld [smem:[#allocation3 + $0x6]] }
  0x68   :  { %2527 = vmatpush3.bf16.msra.mxu0 %v3035_v8  ;;  %v338_v54 = vsel %vm118_vm1, %v331_v53, %v336_v52  ;;  %s2179_s11 = sld [smem:[#allocation3 + $0x87]] }
  0x69   :  { %2534 = vmatprep.subr.bf16.mxu0 %v2881_v4  ;;  %s2178_s13 = sld [smem:[#allocation3 + $0x7]] }
  0x6c   :  { %s773_s27 = scalar_lea.vmem [#allocation6], %s2175_s0 }
  0x6d   :  { %s770_s30 = scalar_lea.vmem [#allocation6], %s2174_s2 }
  0x6e   :  { %s883_s14 = scalar_lea.vmem [#allocation6], %s2179_s11 }
  0x6f   :  { %s880_s16 = scalar_lea.vmem [#allocation6], %s2178_s13 }
 0x136   :  { %v190_v13 = vpop.f32.mrb[0].mxu0 }
 0x137   :  { %v194_v14 = vadd.f32 %v190_v13, %v119_v12  ;;  %v2311_v15 = vpop.f32.mrb[1].mxu0 }
 0x139   :  { %2638 = vtanh.f32 %v194_v14  ;;  %v2153_v17 = vmul.f32 -1.442695, %v194_v14 }
 0x13b   :  { %2640 = vpow2.f32 %v2153_v17 }
 0x143   :  { %v2639_v16 = vpop.eup %2638 }
 0x144   :  { %204 = vrot.lane.b32.xlu0 %v2639_v16, %s2884_s12  ;;  %v444_v16 = vld [vmem:[%s443_s23] sm:$0x1] }
 0x145   :  { %v2641_v18 = vpop.eup %2640  ;;  %v446_v17 = vrot.slane %v444_v16, 7 }
 0x146   :  { %v198_v19 = vadd.f32 1.0, %v2641_v18  ;;  %v441_v18 = vld [vmem:[%s440_s4] sm:$0x1] }
 0x148   :  { %2642 = vrcp.f32 %v198_v19  ;;  %v448_v19 = vsel %vm118_vm1, %v441_v18, %v446_v17 }
 0x152   :  { %v2643_v20 = vpop.eup %2642 }
 0x153   :  { %v202_v23 = vmul.f32 0.0, %v2643_v20 }
 0x1b6   :  { %v205_v21 = vpop.permute.xlu0 %204 }
 0x1b7   :  { %v207_v22 = vmul.f32 %v2643_v20, %v205_v21 }
 0x1b9   :  { %209 = vrot.lane.b32.xlu0 %v207_v22, %s2885_s1 }
 0x22b   :  { %v210_v24 = vpop.permute.xlu0 %209 }
 0x22c   :  { %v212_v25 = vadd.f32 %v210_v24, %v202_v23 }
 0x22e   :  { %2644 = vtanh.f32 %v212_v25 }
 0x238   :  { %v2645_v26 = vpop.eup %2644 }
 0x239   :  { %215 = vrot.lane.b32.xlu1 %v2645_v26, %s2884_s12 }
 0x2ab   :  { %v216_v27 = vpop.permute.xlu1 %215 }
 0x2ac   :  { %v3055_v28 = vmul.f32 %v2643_v20, %v216_v27 }
 0x2ae   :  { %230 = vrot.lane.b32.xlu1 %v3055_v28, %s2885_s1 }
 0x320   :  { %v231_v29 = vpop.permute.xlu1 %230 }
 0x321   :  { %2321 = vmatmul.mubr.msk.f32.vlgmr.msra.gmra.mrb[0].mxu1 %vm120_vm2, %v231_v29 }
 0x322   :  { %2530 = vmatpush3.bf16.msra.mxu1 %v3024_v5  ;;  %2342 = vmatprep.mubr.msk.f32.mxu1 %vm2882_vm0, %v2883_v7 }
 0x323   :  { %2531 = vmatprep.subr.bf16.mxu1 %v2881_v4 }
 0x326   :  { %2533 = vmatpush3.bf16.msra.mxu1 %v3035_v8 }
 0x327   :  { %2540 = vmatprep.subr.bf16.mxu1 %v2881_v4 }
 0x3f4   :  { %v300_v34 = vpop.f32.mrb[0].mxu1 }
 0x3f5   :  { %v304_v35 = vadd.f32 %v300_v34, %v228_v33  ;;  %v2322_v36 = vpop.f32.mrb[1].mxu1 }
 0x3f7   :  { %2646 = vtanh.f32 %v304_v35  ;;  %v2157_v38 = vmul.f32 -1.442695, %v304_v35 }
 0x3f9   :  { %2648 = vpow2.f32 %v2157_v38 }
 0x401   :  { %v2647_v37 = vpop.eup %2646 }
 0x402   :  { %314 = vrot.lane.b32.xlu0 %v2647_v37, %s2884_s12 }
 0x403   :  { %v2649_v39 = vpop.eup %2648 }
 0x404   :  { %v308_v40 = vadd.f32 1.0, %v2649_v39  ;;  %v554_v39 = vld [vmem:[%s553_s9] sm:$0x1] }
 0x406   :  { %2650 = vrcp.f32 %v308_v40  ;;  %v556_v40 = vrot.slane %v554_v39, 7 }
 0x410   :  { %v2651_v41 = vpop.eup %2650 }
 0x411   :  { %v312_v44 = vmul.f32 %v2651_v41, %v212_v25 }
 0x474   :  { %v315_v42 = vpop.permute.xlu0 %314 }
 0x475   :  { %v317_v43 = vmul.f32 %v2651_v41, %v315_v42 }
 0x477   :  { %319 = vrot.lane.b32.xlu1 %v317_v43, %s2885_s1 }
 0x4e9   :  { %v320_v45 = vpop.permute.xlu1 %319 }
 0x4ea   :  { %v322_v46 = vadd.f32 %v320_v45, %v312_v44 }
 0x4ec   :  { %2652 = vtanh.f32 %v322_v46 }
 0x4f6   :  { %v2653_v47 = vpop.eup %2652 }
 0x4f7   :  { %325 = vrot.lane.b32.xlu0 %v2653_v47, %s2884_s12 }
 0x569   :  { %v326_v48 = vpop.permute.xlu0 %325 }
 0x56a   :  { %v328_v49 = vmul.f32 %v2651_v41, %v326_v48  ;;  %v551_v41 = vld [vmem:[%s550_s25] sm:$0x1] }
 0x56b   :  { %v558_v42 = vsel %vm118_vm1, %v551_v41, %v556_v40 }
 0x56c   :  { %340 = vrot.lane.b32.xlu1 %v328_v49, %s2885_s1  ;;  %v989_v9 = vrot.slane %v328_v49, 6 }
 0x56e   :  { %v1003_v13 = vsel %vm1002_vm3, %v3055_v28, %v989_v9 }
 0x5de   :  { %v341_v50 = vpop.permute.xlu1 %340 }
 0x5df   :  { %2332 = vmatmul.mubr.msk.f32.vlgmr.msra.gmra.mrb[2].mxu0 %vm120_vm2, %v341_v50 }
 0x5e0   :  { %2536 = vmatpush3.bf16.msra.mxu0 %v3024_v5  ;;  %2353 = vmatprep.mubr.msk.f32.mxu0 %vm2882_vm0, %v2883_v7 }
 0x5e1   :  { %2537 = vmatprep.subr.bf16.mxu0 %v2881_v4 }
 0x5e4   :  { %2539 = vmatpush3.bf16.msra.mxu0 %v3035_v8 }
 0x5e5   :  { %2546 = vmatprep.subr.bf16.mxu0 %v2881_v4 }
 0x6b2   :  { %v410_v55 = vpop.f32.mrb[2].mxu0 }
 0x6b3   :  { %v414_v56 = vadd.f32 %v410_v55, %v338_v54  ;;  %v2333_v57 = vpop.f32.mrb[3].mxu0 }
 0x6b5   :  { %2654 = vtanh.f32 %v414_v56  ;;  %v2161_v59 = vmul.f32 -1.442695, %v414_v56 }
 0x6b7   :  { %2656 = vpow2.f32 %v2161_v59 }
 0x6bf   :  { %v2655_v58 = vpop.eup %2654 }
 0x6c0   :  { %424 = vrot.lane.b32.xlu0 %v2655_v58, %s2884_s12 }
 0x6c1   :  { %v2657_v60 = vpop.eup %2656 }
 0x6c2   :  { %v418_v61 = vadd.f32 1.0, %v2657_v60  ;;  %v664_v60 = vld [vmem:[%s663_s29] sm:$0x1] }
 0x6c4   :  { %2658 = vrcp.f32 %v418_v61  ;;  %v666_v61 = vrot.slane %v664_v60, 7 }
 0x6ce   :  { %v2659_v62 = vpop.eup %2658 }
 0x6cf   :  { %v422_v1 = vmul.f32 %v2659_v62, %v322_v46 }
 0x732   :  { %v425_v63 = vpop.permute.xlu0 %424 }
 0x733   :  { %v427_v0 = vmul.f32 %v2659_v62, %v425_v63 }
 0x735   :  { %429 = vrot.lane.b32.xlu1 %v427_v0, %s2885_s1 }
 0x7a7   :  { %v430_v2 = vpop.permute.xlu1 %429 }
 0x7a8   :  { %v432_v3 = vadd.f32 %v430_v2, %v422_v1 }
 0x7aa   :  { %2660 = vtanh.f32 %v432_v3 }
 0x7b4   :  { %v2661_v6 = vpop.eup %2660 }
 0x7b5   :  { %435 = vrot.lane.b32.xlu0 %v2661_v6, %s2884_s12 }
 0x827   :  { %v436_v10 = vpop.permute.xlu0 %435 }
 0x828   :  { %v438_v11 = vmul.f32 %v2659_v62, %v436_v10  ;;  %v661_v62 = vld [vmem:[%s660_s6] sm:$0x1] }
 0x829   :  { %v668_v63 = vsel %vm118_vm1, %v661_v62, %v666_v61 }
 0x82a   :  { %v991_v12 = vrot.slane %v438_v11, 4  ;;  %450 = vrot.lane.b32.xlu1 %v438_v11, %s2885_s1 }
 0x82c   :  { %v1005_v14 = vsel %vm1004_vm4, %v1003_v13, %v991_v12 }
 0x89c   :  { %v451_v15 = vpop.permute.xlu1 %450 }
 0x89d   :  { %2343 = vmatmul.mubr.msk.f32.vlgmr.msra.gmra.mrb[2].mxu1 %vm120_vm2, %v451_v15 }
 0x89e   :  { %2542 = vmatpush3.bf16.msra.mxu1 %v3024_v5  ;;  %2364 = vmatprep.mubr.msk.f32.mxu1 %vm2882_vm0, %v2883_v7 }
 0x89f   :  { %2543 = vmatprep.subr.bf16.mxu1 %v2881_v4 }
 0x8a2   :  { %2545 = vmatpush3.bf16.msra.mxu1 %v3035_v8 }
 0x8a3   :  { %2552 = vmatprep.subr.bf16.mxu1 %v2881_v4 }
 0x970   :  { %v520_v20 = vpop.f32.mrb[2].mxu1 }
 0x971   :  { %v524_v21 = vadd.f32 %v520_v20, %v448_v19  ;;  %v2344_v22 = vpop.f32.mrb[3].mxu1  ;;  %v774_v19 = vld [vmem:[%s773_s27] sm:$0x1] }
 0x972   :  { %v776_v20 = vrot.slane %v774_v19, 7 }
 0x973   :  { %2662 = vtanh.f32 %v524_v21  ;;  %v2165_v24 = vmul.f32 -1.442695, %v524_v21  ;;  %v771_v21 = vld [vmem:[%s770_s30] sm:$0x1] }
 0x974   :  { %v778_v22 = vsel %vm118_vm1, %v771_v21, %v776_v20  ;;  %v2182_v21 = vld [vmem:[%s3291_s5] ss:$0 sm:$0xff] }
 0x975   :  { %2664 = vpow2.f32 %v2165_v24 }
 0x97d   :  { %v2663_v23 = vpop.eup %2662 }
 0x97e   :  { %534 = vrot.lane.b32.xlu0 %v2663_v23, %s2884_s12 }
 0x97f   :  { %v2665_v25 = vpop.eup %2664 }
 0x980   :  { %v528_v26 = vadd.f32 1.0, %v2665_v25 }
 0x982   :  { %2666 = vrcp.f32 %v528_v26 }
 0x98c   :  { %v2667_v27 = vpop.eup %2666 }
 0x98d   :  { %v532_v30 = vmul.f32 %v2667_v27, %v432_v3 }
 0x9f0   :  { %v535_v28 = vpop.permute.xlu0 %534 }
 0x9f1   :  { %v537_v29 = vmul.f32 %v2667_v27, %v535_v28 }
 0x9f3   :  { %539 = vrot.lane.b32.xlu1 %v537_v29, %s2885_s1 }
 0xa65   :  { %v540_v31 = vpop.permute.xlu1 %539 }
 0xa66   :  { %v542_v32 = vadd.f32 %v540_v31, %v532_v30 }
 0xa68   :  { %2668 = vtanh.f32 %v542_v32 }
 0xa72   :  { %v2669_v33 = vpop.eup %2668 }
 0xa73   :  { %545 = vrot.lane.b32.xlu0 %v2669_v33, %s2884_s12 }
 0xae5   :  { %v546_v34 = vpop.permute.xlu0 %545 }
 0xae6   :  { %v548_v35 = vmul.f32 %v2667_v27, %v546_v34 }
 0xae8   :  { %v993_v36 = vrot.slane %v548_v35, 2  ;;  %560 = vrot.lane.b32.xlu1 %v548_v35, %s2885_s1 }
 0xaea   :  { %v3099_v37 = vsel %vm1006_vm5, %v1005_v14, %v993_v36 }
 0xb5a   :  { %v561_v38 = vpop.permute.xlu1 %560 }
 0xb5b   :  { %2354 = vmatmul.mubr.msk.f32.vlgmr.msra.gmra.mrb[4].mxu0 %vm120_vm2, %v561_v38 }
 0xb5c   :  { %2548 = vmatpush3.bf16.msra.mxu0 %v3024_v5  ;;  %2375 = vmatprep.mubr.msk.f32.mxu0 %vm2882_vm0, %v2883_v7 }
 0xb5d   :  { %2549 = vmatprep.subr.bf16.mxu0 %v2881_v4 }
 0xb60   :  { %2551 = vmatpush3.bf16.msra.mxu0 %v3035_v8 }
 0xc2e   :  { %v630_v43 = vpop.f32.mrb[4].mxu0 }
 0xc2f   :  { %v634_v44 = vadd.f32 %v630_v43, %v558_v42  ;;  %v2355_v45 = vpop.f32.mrb[5].mxu0 }
 0xc30   :  { %v884_v45 = vld [vmem:[%s883_s14] sm:$0x1] }
 0xc31   :  { %2670 = vtanh.f32 %v634_v44  ;;  %v2169_v47 = vmul.f32 -1.442695, %v634_v44 }
 0xc33   :  { %2672 = vpow2.f32 %v2169_v47  ;;  %v881_v47 = vld [vmem:[%s880_s16] sm:$0x1] }
 0xc3b   :  { %v2671_v46 = vpop.eup %2670 }
 0xc3c   :  { %644 = vrot.lane.b32.xlu0 %v2671_v46, %s2884_s12  ;;  %v886_v46 = vrot.slane %v884_v45, 7 }
 0xc3d   :  { %v2673_v48 = vpop.eup %2672 }
 0xc3e   :  { %v638_v49 = vadd.f32 1.0, %v2673_v48  ;;  %v888_v48 = vsel %vm118_vm1, %v881_v47, %v886_v46 }
 0xc40   :  { %2674 = vrcp.f32 %v638_v49 }
 0xc4a   :  { %v2675_v50 = vpop.eup %2674 }
 0xc4b   :  { %v642_v53 = vmul.f32 %v2675_v50, %v542_v32 }
 0xcae   :  { %v645_v51 = vpop.permute.xlu0 %644 }
 0xcaf   :  { %v647_v52 = vmul.f32 %v2675_v50, %v645_v51 }
 0xcb1   :  { %649 = vrot.lane.b32.xlu1 %v647_v52, %s2885_s1 }
 0xd23   :  { %v650_v54 = vpop.permute.xlu1 %649 }
 0xd24   :  { %v652_v55 = vadd.f32 %v650_v54, %v642_v53 }
 0xd26   :  { %2676 = vtanh.f32 %v652_v55 }
 0xd30   :  { %v2677_v56 = vpop.eup %2676 }
 0xd31   :  { %655 = vrot.lane.b32.xlu0 %v2677_v56, %s2884_s12 }
 0xda3   :  { %v656_v57 = vpop.permute.xlu0 %655 }
 0xda4   :  { %v3111_v58 = vmul.f32 %v2675_v50, %v656_v57 }
 0xda6   :  { %670 = vrot.lane.b32.xlu1 %v3111_v58, %s2885_s1 }
 0xe18   :  { %v671_v59 = vpop.permute.xlu1 %670 }
 0xe19   :  { %2365 = vmatmul.mubr.msk.f32.vlgmr.msra.gmra.mrb[4].mxu1 %vm120_vm2, %v671_v59 }
 0xe1a   :  { %2554 = vmatpush3.bf16.msra.mxu1 %v3024_v5  ;;  %2386 = vmatprep.mubr.msk.f32.mxu1 %vm2882_vm0, %v2883_v7 }
 0xe1b   :  { %2555 = vmatprep.subr.bf16.mxu1 %v2881_v4 }
 0xe1e   :  { %2557 = vmatpush3.bf16.msra.mxu1 %v3035_v8 }
 0xe1f   :  { %2566 = vmatprep.subr.bf16.mxu1 %v2881_v4 }
 0xeec   :  { %v740_v0 = vpop.f32.mrb[4].mxu1 }
 0xeed   :  { %v744_v5 = vadd.f32 %v740_v0, %v668_v63  ;;  %v2366_v1 = vpop.f32.mrb[5].mxu1  ;;  %v1107_v63 = vld [vmem:[#allocation9] sm:$0xff]  ;;  %v1108_v0 = vld [vmem:[#allocation9 + $0x8] sm:$0xff] }
 0xeee   :  { %v3148_v1 = vpack.c.bf16 %v1108_v0, %v1107_v63 }
 0xeef   :  { %2678 = vtanh.f32 %v744_v5  ;;  %v2173_v3 = vmul.f32 -1.442695, %v744_v5  ;;  %v1011_v5 = vld [vmem:[#allocation7] sm:$0xff] }
 0xef1   :  { %2680 = vpow2.f32 %v2173_v3  ;;  %v1109_v3 = vld [vmem:[#allocation9 + $0x10] sm:$0xff] }
 0xef9   :  { %v2679_v2 = vpop.eup %2678 }
 0xefa   :  { %754 = vrot.lane.b32.xlu0 %v2679_v2, %s2884_s12  ;;  %v1012_v2 = vld [vmem:[#allocation7 + $0x8] sm:$0xff] }
 0xefb   :  { %v2681_v8 = vpop.eup %2680 }
 0xefc   :  { %v748_v6 = vadd.f32 1.0, %v2681_v8  ;;  %v1110_v8 = vld [vmem:[#allocation9 + $0x18] sm:$0xff] }
 0xefe   :  { %2682 = vrcp.f32 %v748_v6  ;;  %v2558_v6 = vpack.c.bf16 %v1012_v2, %v1011_v5 }
 0xf00   :  { %2559 = vmatprep.subr.bf16.mxu0 %v2558_v6 }
 0xf08   :  { %v2683_v9 = vpop.eup %2682 }
 0xf09   :  { %v752_v12 = vmul.f32 %v2683_v9, %v652_v55 }
 0xf6c   :  { %v755_v10 = vpop.permute.xlu0 %754 }
 0xf6d   :  { %v757_v11 = vmul.f32 %v2683_v9, %v755_v10  ;;  %v3151_v10 = vpack.c.bf16 %v1110_v8, %v1109_v3 }
 0xf6f   :  { %759 = vrot.lane.b32.xlu1 %v757_v11, %s2885_s1 }
 0xfe1   :  { %v760_v13 = vpop.permute.xlu1 %759 }
 0xfe2   :  { %v762_v14 = vadd.f32 %v760_v13, %v752_v12 }
 0xfe4   :  { %2684 = vtanh.f32 %v762_v14 }
 0xfee   :  { %v2685_v15 = vpop.eup %2684 }
 0xfef   :  { %765 = vrot.lane.b32.xlu0 %v2685_v15, %s2884_s12 }
0x1061   :  { %v766_v16 = vpop.permute.xlu0 %765 }
0x1062   :  { %v768_v17 = vmul.f32 %v2683_v9, %v766_v16  ;;  %v1013_v9 = vld [vmem:[#allocation7 + $0x10] sm:$0xff] }
0x1064   :  { %780 = vrot.lane.b32.xlu1 %v768_v17, %s2885_s1  ;;  %v995_v38 = vrot.slane %v768_v17, 6 }
0x1066   :  { %v1008_v42 = vsel %vm1002_vm3, %v3111_v58, %v995_v38 }
0x10d6   :  { %v781_v18 = vpop.permute.xlu1 %780 }
0x10d7   :  { %2376 = vmatmul.mubr.msk.f32.vlgmr.msra.gmra.mrb[6].mxu0 %vm120_vm2, %v781_v18 }
0x10d8   :  { %2561 = vmatpush3.bf16.msra.mxu0 %v2558_v6 }
0x11aa   :  { %v850_v23 = vpop.f32.mrb[6].mxu0 }
0x11ab   :  { %v854_v24 = vadd.f32 %v850_v23, %v778_v22  ;;  %v2377_v25 = vpop.f32.mrb[7].mxu0 }
0x11ad   :  { %2686 = vtanh.f32 %v854_v24  ;;  %v2177_v27 = vmul.f32 -1.442695, %v854_v24 }
0x11af   :  { %2688 = vpow2.f32 %v2177_v27 }
0x11b7   :  { %v2687_v26 = vpop.eup %2686 }
0x11b8   :  { %864 = vrot.lane.b32.xlu0 %v2687_v26, %s2884_s12 }
0x11b9   :  { %v2689_v28 = vpop.eup %2688 }
0x11ba   :  { %v858_v29 = vadd.f32 1.0, %v2689_v28 }
0x11bc   :  { %2690 = vrcp.f32 %v858_v29 }
0x11c6   :  { %v2691_v30 = vpop.eup %2690 }
0x11c7   :  { %v862_v33 = vmul.f32 %v2691_v30, %v762_v14 }
0x122a   :  { %v865_v31 = vpop.permute.xlu0 %864 }
0x122b   :  { %v867_v32 = vmul.f32 %v2691_v30, %v865_v31 }
0x122d   :  { %869 = vrot.lane.b32.xlu1 %v867_v32, %s2885_s1 }
0x129f   :  { %v870_v34 = vpop.permute.xlu1 %869 }
0x12a0   :  { %v872_v35 = vadd.f32 %v870_v34, %v862_v33 }
0x12a2   :  { %2692 = vtanh.f32 %v872_v35 }
0x12ac   :  { %v2693_v36 = vpop.eup %2692 }
0x12ad   :  { %875 = vrot.lane.b32.xlu0 %v2693_v36, %s2884_s12 }
0x131f   :  { %v876_v39 = vpop.permute.xlu0 %875 }
0x1320   :  { %v878_v40 = vmul.f32 %v2691_v30, %v876_v39 }
0x1322   :  { %v997_v41 = vrot.slane %v878_v40, 4  ;;  %890 = vrot.lane.b32.xlu1 %v878_v40, %s2885_s1 }
0x1324   :  { %v1009_v43 = vsel %vm1004_vm4, %v1008_v42, %v997_v41 }
0x1394   :  { %v891_v44 = vpop.permute.xlu1 %890 }
0x1395   :  { %2387 = vmatmul.mubr.msk.f32.vlgmr.msra.gmra.mrb[6].mxu1 %vm120_vm2, %v891_v44 }
0x1396   :  { %2408 = vmatprep.mubr.msk.f32.mxu1 %vm2882_vm0, %v2883_v7  ;;  %2568 = vmatpush3.bf16.msra.mxu1 %v3148_v1 }
0x1397   :  { %2569 = vmatprep.subr.bf16.mxu1 %v2881_v4 }
0x139a   :  { %2571 = vmatpush3.bf16.msra.mxu1 %v3151_v10 }
0x139b   :  { %2578 = vmatprep.subr.bf16.mxu1 %v2881_v4 }
0x1468   :  { %v960_v49 = vpop.f32.mrb[6].mxu1 }
0x1469   :  { %v964_v50 = vadd.f32 %v960_v49, %v888_v48  ;;  %v2388_v51 = vpop.f32.mrb[7].mxu1 }
0x146b   :  { %2694 = vtanh.f32 %v964_v50  ;;  %v2181_v53 = vmul.f32 -1.442695, %v964_v50 }
0x146d   :  { %2696 = vpow2.f32 %v2181_v53 }
0x1475   :  { %v2695_v52 = vpop.eup %2694 }
0x1476   :  { %974 = vrot.lane.b32.xlu0 %v2695_v52, %s2884_s12 }
0x1477   :  { %v2697_v54 = vpop.eup %2696 }
0x1478   :  { %v968_v55 = vadd.f32 1.0, %v2697_v54 }
0x147a   :  { %2698 = vrcp.f32 %v968_v55 }
0x1484   :  { %v2699_v56 = vpop.eup %2698 }
0x1485   :  { %v972_v59 = vmul.f32 %v2699_v56, %v872_v35 }
0x14e8   :  { %v975_v57 = vpop.permute.xlu0 %974 }
0x14e9   :  { %v977_v58 = vmul.f32 %v2699_v56, %v975_v57 }
0x14eb   :  { %979 = vrot.lane.b32.xlu1 %v977_v58, %s2885_s1 }
0x14ef   :  { %1024 = vrot.lane.b32.xlu1 %v3099_v37, %s2885_s1  ;;  %v1014_v37 = vld [vmem:[#allocation7 + $0x18] sm:$0xff] }
0x14f0   :  { %v2562_v11 = vpack.c.bf16 %v1014_v37, %v1013_v9 }
0x14f2   :  { %2563 = vmatprep.subr.bf16.mxu0 %v2562_v11 }
0x14f3   :  { %2565 = vmatpush3.bf16.msra.mxu0 %v2562_v11 }
0x14f4   :  { %2572 = vmatprep.subr.bf16.mxu0 %v2881_v4 }
0x155d   :  { %v980_v60 = vpop.permute.xlu1 %979 }
0x155e   :  { %v3144_v61 = vadd.f32 %v980_v60, %v972_v59 }
0x1560   :  { %2700 = vtanh.f32 %v3144_v61 }
0x1561   :  { %v1025_v62 = vpop.permute.xlu1 %1024 }
0x1562   :  { %2397 = vmatprep.mubr.msk.f32.mxu0 %vm120_vm2, %v1025_v62 }
0x156a   :  { %v2701_v12 = vpop.eup %2700 }
0x156b   :  { %985 = vrot.lane.b32.xlu0 %v2701_v12, %s2884_s12 }
0x15dd   :  { %v986_v13 = vpop.permute.xlu0 %985 }
0x15de   :  { %v988_v14 = vmul.f32 %v2699_v56, %v986_v13 }
0x15e0   :  { %v1000_v15 = vrot.slane %v988_v14, 2  ;;  %1111 = vrot.lane.b32.xlu1 %v988_v14, %s2885_s1 }
0x15e2   :  { %v1010_v16 = vsel %vm1006_vm5, %v1009_v43, %v1000_v15 }
0x15e3   :  { %1026 = vrot.lane.b32.xlu0 %v1010_v16, %s2885_s1 }
0x1652   :  { %v1112_v17 = vpop.permute.xlu1 %1111 }
0x1653   :  { %2409 = vmatmul.mubr.msk.f32.vlgmr.msra.gmra.mrb[8].mxu1 %vm120_vm2, %v1112_v17 }
0x1654   :  { %2580 = vmatpush3.bf16.msra.mxu1 %v3148_v1  ;;  %2430 = vmatprep.mubr.msk.f32.mxu1 %vm2882_vm0, %v2883_v7 }
0x1655   :  { %v1027_v18 = vpop.permute.xlu0 %1026  ;;  %2581 = vmatprep.subr.bf16.mxu1 %v2881_v4 }
0x1656   :  { %2398 = vmatmul.mubr.msk.f32.vlgmr.msra.gmra.mrb[8].mxu0 %vm120_vm2, %v1027_v18 }
0x1657   :  { %2574 = vmatpush3.bf16.msra.mxu0 %v3148_v1  ;;  %2419 = vmatprep.mubr.msk.f32.mxu0 %vm2882_vm0, %v2883_v7 }
0x1658   :  { %2575 = vmatprep.subr.bf16.mxu0 %v2881_v4  ;;  %2583 = vmatpush3.bf16.msra.mxu1 %v3151_v10 }
0x1659   :  { %2590 = vmatprep.subr.bf16.mxu1 %v2881_v4 }
0x165b   :  { %2577 = vmatpush3.bf16.msra.mxu0 %v3151_v10 }
0x165c   :  { %2584 = vmatprep.subr.bf16.mxu0 %v2881_v4 }
0x1726   :  { %v1181_v19 = vpop.f32.mrb[8].mxu1 }
0x1727   :  { %v2410_v20 = vpop.f32.mrb[9].mxu1 }
0x1729   :  { %v2399_v22 = vpop.f32.mrb[8].mxu0 }
0x172a   :  { %v3178_v23 = vadd.f32 %v2399_v22, %v2182_v21  ;;  %v1098_v24 = vpop.f32.mrb[9].mxu0 }
0x172b   :  { %v3180_v25 = vadd.f32 %v2182_v21, %v1098_v24 }
0x172d   :  { %v1185_v26 = vadd.f32 %v1181_v19, %v3180_v25 }
0x172f   :  { %2702 = vtanh.f32 %v1185_v26  ;;  %v2186_v28 = vmul.f32 -1.442695, %v1185_v26 }
0x1731   :  { %2704 = vpow2.f32 %v2186_v28 }
0x1739   :  { %v2703_v27 = vpop.eup %2702 }
0x173a   :  { %1195 = vrot.lane.b32.xlu0 %v2703_v27, %s2884_s12 }
0x173b   :  { %v2705_v29 = vpop.eup %2704 }
0x173c   :  { %v1189_v30 = vadd.f32 1.0, %v2705_v29 }
0x173e   :  { %2706 = vrcp.f32 %v1189_v30 }
0x1748   :  { %v2707_v31 = vpop.eup %2706 }
0x1749   :  { %v1193_v34 = vmul.f32 %v2707_v31, %v3144_v61 }
0x17ac   :  { %v1196_v32 = vpop.permute.xlu0 %1195 }
0x17ad   :  { %v1198_v33 = vmul.f32 %v2707_v31, %v1196_v32 }
0x17af   :  { %1200 = vrot.lane.b32.xlu1 %v1198_v33, %s2885_s1 }
0x1821   :  { %v1201_v35 = vpop.permute.xlu1 %1200 }
0x1822   :  { %v1203_v36 = vadd.f32 %v1201_v35, %v1193_v34 }
0x1824   :  { %2708 = vtanh.f32 %v1203_v36  ;;  %v1297_v53 = vrot.slane %v1203_v36, 6 }
0x182e   :  { %v2709_v38 = vpop.eup %2708 }
0x182f   :  { %1206 = vrot.lane.b32.xlu0 %v2709_v38, %s2884_s12 }
0x18a1   :  { %v1207_v39 = vpop.permute.xlu0 %1206 }
0x18a2   :  { %v1209_v40 = vmul.f32 %v2707_v31, %v1207_v39 }
0x18a4   :  { %1211 = vrot.lane.b32.xlu1 %v1209_v40, %s2885_s1 }
0x1916   :  { %v1212_v41 = vpop.permute.xlu1 %1211 }
0x1917   :  { %2420 = vmatmul.mubr.msk.f32.vlgmr.msra.gmra.mrb[10].mxu0 %vm120_vm2, %v1212_v41 }
0x1918   :  { %2586 = vmatpush3.bf16.msra.mxu0 %v3148_v1  ;;  %2441 = vmatprep.mubr.msk.f32.mxu0 %vm2882_vm0, %v2883_v7 }
0x1919   :  { %2587 = vmatprep.subr.bf16.mxu0 %v2881_v4 }
0x191c   :  { %2589 = vmatpush3.bf16.msra.mxu0 %v3151_v10 }
0x191d   :  { %2596 = vmatprep.subr.bf16.mxu0 %v2881_v4 }
0x19ea   :  { %v1281_v42 = vpop.f32.mrb[10].mxu0 }
0x19eb   :  { %v1286_v43 = vrot.slane %v1281_v42, 6  ;;  %v2421_v44 = vpop.f32.mrb[11].mxu0 }
0x19ed   :  { %v1288_v45 = vadd.f32 %v1286_v43, %v3180_v25 }
0x19ef   :  { %2710 = vtanh.f32 %v1288_v45  ;;  %v2188_v47 = vmul.f32 -1.442695, %v1288_v45 }
0x19f1   :  { %2712 = vpow2.f32 %v2188_v47 }
0x19f9   :  { %v2711_v46 = vpop.eup %2710 }
0x19fa   :  { %1301 = vrot.lane.b32.xlu0 %v2711_v46, %s2884_s12 }
0x19fb   :  { %v2713_v48 = vpop.eup %2712 }
0x19fc   :  { %v1292_v49 = vadd.f32 1.0, %v2713_v48 }
0x19fe   :  { %2714 = vrcp.f32 %v1292_v49 }
0x1a08   :  { %v2715_v50 = vpop.eup %2714 }
0x1a09   :  { %v1299_v54 = vmul.f32 %v2715_v50, %v1297_v53 }
0x1a6c   :  { %v1302_v51 = vpop.permute.xlu0 %1301 }
0x1a6d   :  { %v1304_v52 = vmul.f32 %v2715_v50, %v1302_v51 }
0x1a6f   :  { %1306 = vrot.lane.b32.xlu1 %v1304_v52, %s2885_s1 }
0x1ae1   :  { %v1307_v55 = vpop.permute.xlu1 %1306 }
0x1ae2   :  { %v1309_v56 = vadd.f32 %v1307_v55, %v1299_v54 }
0x1ae4   :  { %2716 = vtanh.f32 %v1309_v56  ;;  %v1404_v12 = vrot.slane %v1309_v56, 6 }
0x1aee   :  { %v2717_v57 = vpop.eup %2716 }
0x1aef   :  { %1312 = vrot.lane.b32.xlu0 %v2717_v57, %s2884_s12 }
0x1b61   :  { %v1313_v58 = vpop.permute.xlu0 %1312 }
0x1b62   :  { %v1315_v59 = vmul.f32 %v2715_v50, %v1313_v58 }
0x1b64   :  { %v1317_v60 = vrot.slane %v1315_v59, 2 }
0x1b66   :  { %1318 = vrot.lane.b32.xlu1 %v1317_v60, %s2885_s1 }
0x1bd8   :  { %v1319_v61 = vpop.permute.xlu1 %1318 }
0x1bd9   :  { %2431 = vmatmul.mubr.msk.f32.vlgmr.msra.gmra.mrb[10].mxu1 %vm120_vm2, %v1319_v61 }
0x1bda   :  { %2592 = vmatpush3.bf16.msra.mxu1 %v3148_v1  ;;  %2452 = vmatprep.mubr.msk.f32.mxu1 %vm2882_vm0, %v2883_v7 }
0x1bdb   :  { %2593 = vmatprep.subr.bf16.mxu1 %v2881_v4 }
0x1bde   :  { %2595 = vmatpush3.bf16.msra.mxu1 %v3151_v10 }
0x1bdf   :  { %2602 = vmatprep.subr.bf16.mxu1 %v2881_v4 }
0x1cac   :  { %v1388_v62 = vpop.f32.mrb[10].mxu1 }
0x1cad   :  { %v1393_v63 = vrot.slane %v1388_v62, 4  ;;  %v2432_v0 = vpop.f32.mrb[11].mxu1 }
0x1caf   :  { %v1395_v5 = vadd.f32 %v1393_v63, %v3180_v25 }
0x1cb1   :  { %2718 = vtanh.f32 %v1395_v5  ;;  %v2190_v3 = vmul.f32 -1.442695, %v1395_v5 }
0x1cb3   :  { %2720 = vpow2.f32 %v2190_v3 }
0x1cbb   :  { %v2719_v2 = vpop.eup %2718 }
0x1cbc   :  { %1408 = vrot.lane.b32.xlu0 %v2719_v2, %s2884_s12 }
0x1cbd   :  { %v2721_v8 = vpop.eup %2720 }
0x1cbe   :  { %v1399_v6 = vadd.f32 1.0, %v2721_v8 }
0x1cc0   :  { %2722 = vrcp.f32 %v1399_v6 }
0x1cca   :  { %v2723_v9 = vpop.eup %2722 }
0x1ccb   :  { %v1406_v13 = vmul.f32 %v2723_v9, %v1404_v12 }
0x1d2e   :  { %v1409_v37 = vpop.permute.xlu0 %1408 }
0x1d2f   :  { %v1411_v11 = vmul.f32 %v2723_v9, %v1409_v37 }
0x1d31   :  { %1413 = vrot.lane.b32.xlu1 %v1411_v11, %s2885_s1 }
0x1da3   :  { %v1414_v14 = vpop.permute.xlu1 %1413 }
0x1da4   :  { %v1416_v15 = vadd.f32 %v1414_v14, %v1406_v13 }
0x1da6   :  { %2724 = vtanh.f32 %v1416_v15  ;;  %v1511_v34 = vrot.slane %v1416_v15, 6 }
0x1db0   :  { %v2725_v16 = vpop.eup %2724 }
0x1db1   :  { %1419 = vrot.lane.b32.xlu0 %v2725_v16, %s2884_s12 }
0x1e23   :  { %v1420_v17 = vpop.permute.xlu0 %1419 }
0x1e24   :  { %v1422_v18 = vmul.f32 %v2723_v9, %v1420_v17 }
0x1e26   :  { %v1424_v19 = vrot.slane %v1422_v18, 4 }
0x1e28   :  { %1425 = vrot.lane.b32.xlu1 %v1424_v19, %s2885_s1 }
0x1e9a   :  { %v1426_v20 = vpop.permute.xlu1 %1425 }
0x1e9b   :  { %2442 = vmatmul.mubr.msk.f32.vlgmr.msra.gmra.mrb[12].mxu0 %vm120_vm2, %v1426_v20 }
0x1e9c   :  { %2598 = vmatpush3.bf16.msra.mxu0 %v3148_v1  ;;  %2463 = vmatprep.mubr.msk.f32.mxu0 %vm2882_vm0, %v2883_v7 }
0x1e9d   :  { %2599 = vmatprep.subr.bf16.mxu0 %v2881_v4 }
0x1ea0   :  { %2601 = vmatpush3.bf16.msra.mxu0 %v3151_v10 }
0x1ea1   :  { %2608 = vmatprep.subr.bf16.mxu0 %v2881_v4 }
0x1f6e   :  { %v1495_v21 = vpop.f32.mrb[12].mxu0 }
0x1f6f   :  { %v1500_v22 = vrot.slane %v1495_v21, 2  ;;  %v2443_v24 = vpop.f32.mrb[13].mxu0 }
0x1f71   :  { %v1502_v26 = vadd.f32 %v1500_v22, %v3180_v25 }
0x1f73   :  { %2726 = vtanh.f32 %v1502_v26  ;;  %v2192_v28 = vmul.f32 -1.442695, %v1502_v26 }
0x1f75   :  { %2728 = vpow2.f32 %v2192_v28 }
0x1f7d   :  { %v2727_v27 = vpop.eup %2726 }
0x1f7e   :  { %1515 = vrot.lane.b32.xlu0 %v2727_v27, %s2884_s12 }
0x1f7f   :  { %v2729_v29 = vpop.eup %2728 }
0x1f80   :  { %v1506_v30 = vadd.f32 1.0, %v2729_v29 }
0x1f82   :  { %2730 = vrcp.f32 %v1506_v30 }
0x1f8c   :  { %v2731_v31 = vpop.eup %2730 }
0x1f8d   :  { %v1513_v35 = vmul.f32 %v2731_v31, %v1511_v34 }
0x1ff0   :  { %v1516_v32 = vpop.permute.xlu0 %1515 }
0x1ff1   :  { %v1518_v33 = vmul.f32 %v2731_v31, %v1516_v32 }
0x1ff3   :  { %1520 = vrot.lane.b32.xlu1 %v1518_v33, %s2885_s1 }
0x2065   :  { %v1521_v36 = vpop.permute.xlu1 %1520 }
0x2066   :  { %v1523_v38 = vadd.f32 %v1521_v36, %v1513_v35 }
0x2068   :  { %2732 = vtanh.f32 %v1523_v38  ;;  %v1615_v53 = vrot.slane %v1523_v38, 6 }
0x2072   :  { %v2733_v25 = vpop.eup %2732 }
0x2073   :  { %1526 = vrot.lane.b32.xlu0 %v2733_v25, %s2884_s12 }
0x20e5   :  { %v1527_v39 = vpop.permute.xlu0 %1526 }
0x20e6   :  { %v1529_v40 = vmul.f32 %v2731_v31, %v1527_v39 }
0x20e8   :  { %v1531_v41 = vrot.slane %v1529_v40, 6 }
0x20ea   :  { %1532 = vrot.lane.b32.xlu1 %v1531_v41, %s2885_s1 }
0x215c   :  { %v1533_v42 = vpop.permute.xlu1 %1532 }
0x215d   :  { %2453 = vmatmul.mubr.msk.f32.vlgmr.msra.gmra.mrb[12].mxu1 %vm120_vm2, %v1533_v42 }
0x215e   :  { %2604 = vmatpush3.bf16.msra.mxu1 %v3148_v1  ;;  %2474 = vmatprep.mubr.msk.f32.mxu1 %vm2882_vm0, %v2883_v7 }
0x215f   :  { %2605 = vmatprep.subr.bf16.mxu1 %v2881_v4 }
0x2162   :  { %2607 = vmatpush3.bf16.msra.mxu1 %v3151_v10 }
0x2163   :  { %2614 = vmatprep.subr.bf16.mxu1 %v2881_v4 }
0x2230   :  { %v1602_v43 = vpop.f32.mrb[12].mxu1 }
0x2231   :  { %v1606_v44 = vadd.f32 %v1602_v43, %v3178_v23  ;;  %v2454_v45 = vpop.f32.mrb[13].mxu1 }
0x2233   :  { %2734 = vtanh.f32 %v1606_v44  ;;  %v2194_v47 = vmul.f32 -1.442695, %v1606_v44 }
0x2235   :  { %2736 = vpow2.f32 %v2194_v47 }
0x223d   :  { %v2735_v46 = vpop.eup %2734 }
0x223e   :  { %1619 = vrot.lane.b32.xlu0 %v2735_v46, %s2884_s12 }
0x223f   :  { %v2737_v48 = vpop.eup %2736 }
0x2240   :  { %v1610_v49 = vadd.f32 1.0, %v2737_v48 }
0x2242   :  { %2738 = vrcp.f32 %v1610_v49 }
0x224c   :  { %v2739_v50 = vpop.eup %2738 }
0x224d   :  { %v1617_v54 = vmul.f32 %v2739_v50, %v1615_v53 }
0x22b0   :  { %v1620_v51 = vpop.permute.xlu0 %1619 }
0x22b1   :  { %v1622_v52 = vmul.f32 %v2739_v50, %v1620_v51 }
0x22b3   :  { %1624 = vrot.lane.b32.xlu1 %v1622_v52, %s2885_s1 }
0x2325   :  { %v1625_v55 = vpop.permute.xlu1 %1624 }
0x2326   :  { %v1627_v56 = vadd.f32 %v1625_v55, %v1617_v54  ;;  %v1955_v54 = vld [vmem:[#allocation10 + $0x8] sm:$0xff]  ;;  %v1956_v55 = vld [vmem:[#allocation10 + $0x10] sm:$0xff] }
0x2328   :  { %2740 = vtanh.f32 %v1627_v56 }
0x2332   :  { %v2741_v57 = vpop.eup %2740 }
0x2333   :  { %1630 = vrot.lane.b32.xlu0 %v2741_v57, %s2884_s12  ;;  %v1957_v57 = vld [vmem:[#allocation10 + $0x18] sm:$0xff] }
0x23a5   :  { %v1631_v58 = vpop.permute.xlu0 %1630 }
0x23a6   :  { %v1633_v59 = vmul.f32 %v2739_v50, %v1631_v58  ;;  %v2618_v58 = vpack.c.bf16 %v1957_v57, %v1956_v55 }
0x23a8   :  { %1635 = vrot.lane.b32.xlu1 %v1633_v59, %s2885_s1 }
0x241a   :  { %v1636_v60 = vpop.permute.xlu1 %1635 }
0x241b   :  { %2464 = vmatmul.mubr.msk.f32.vlgmr.msra.gmra.mrb[14].mxu0 %vm120_vm2, %v1636_v60  ;;  %v2042_v60 = vld [vmem:[%s3294_s8] sm:$0xff] }
0x241c   :  { %2610 = vmatpush3.bf16.msra.mxu0 %v3148_v1  ;;  %2485 = vmatprep.mubr.msk.f32.mxu0 %vm2882_vm0, %v2883_v7 }
0x241d   :  { %2611 = vmatprep.subr.bf16.mxu0 %v2881_v4 }
0x2420   :  { %2613 = vmatpush3.bf16.msra.mxu0 %v3151_v10  ;;  %v1721_v10 = vrot.slane %v1627_v56, 6 }
0x2421   :  { %2620 = vmatprep.subr.bf16.mxu0 %v2881_v4 }
0x24ee   :  { %v1705_v61 = vpop.f32.mrb[14].mxu0 }
0x24ef   :  { %v1710_v62 = vrot.slane %v1705_v61, 6  ;;  %v2465_v63 = vpop.f32.mrb[15].mxu0  ;;  %v2043_v61 = vld [vmem:[%s3294_s8 + $0x8] sm:$0xff] }
0x24f1   :  { %v1712_v0 = vadd.f32 %v1710_v62, %v3178_v23  ;;  %v2621_v62 = vpack.c.bf16 %v2043_v61, %v2042_v60 }
0x24f3   :  { %2742 = vtanh.f32 %v1712_v0  ;;  %v2196_v2 = vmul.f32 -1.442695, %v1712_v0 }
0x24f5   :  { %2744 = vpow2.f32 %v2196_v2 }
0x24fd   :  { %v2743_v5 = vpop.eup %2742 }
0x24fe   :  { %1725 = vrot.lane.b32.xlu0 %v2743_v5, %s2884_s12 }
0x24ff   :  { %v2745_v1 = vpop.eup %2744 }
0x2500   :  { %v1716_v3 = vadd.f32 1.0, %v2745_v1  ;;  %v2044_v1 = vld [vmem:[%s3294_s8 + $0x10] sm:$0xff] }
0x2502   :  { %2746 = vrcp.f32 %v1716_v3  ;;  %v2045_v3 = vld [vmem:[%s3294_s8 + $0x18] sm:$0xff] }
0x250c   :  { %v2747_v8 = vpop.eup %2746 }
0x250d   :  { %v1723_v37 = vmul.f32 %v2747_v8, %v1721_v10 }
0x2570   :  { %v1726_v6 = vpop.permute.xlu0 %1725 }
0x2571   :  { %v1728_v9 = vmul.f32 %v2747_v8, %v1726_v6 }
0x2573   :  { %1730 = vrot.lane.b32.xlu1 %v1728_v9, %s2885_s1 }
0x25e5   :  { %v1731_v11 = vpop.permute.xlu1 %1730 }
0x25e6   :  { %v1733_v12 = vadd.f32 %v1731_v11, %v1723_v37  ;;  %v2203_v11 = vld [vmem:[#allocation2] ss:$0 sm:$0xff] }
0x25e8   :  { %2748 = vtanh.f32 %v1733_v12  ;;  %v1828_v31 = vrot.slane %v1733_v12, 6 }
0x25f2   :  { %v2749_v13 = vpop.eup %2748 }
0x25f3   :  { %1736 = vrot.lane.b32.xlu0 %v2749_v13, %s2884_s12 }
0x2665   :  { %v1737_v14 = vpop.permute.xlu0 %1736 }
0x2666   :  { %v1739_v15 = vmul.f32 %v2747_v8, %v1737_v14  ;;  %v2624_v8 = vpack.c.bf16 %v2045_v3, %v2044_v1 }
0x2668   :  { %v1741_v16 = vrot.slane %v1739_v15, 2 }
0x266a   :  { %1742 = vrot.lane.b32.xlu1 %v1741_v16, %s2885_s1 }
0x26dc   :  { %v1743_v17 = vpop.permute.xlu1 %1742 }
0x26dd   :  { %2475 = vmatmul.mubr.msk.f32.vlgmr.msra.gmra.mrb[14].mxu1 %vm120_vm2, %v1743_v17 }
0x26de   :  { %2496 = vmatprep.mubr.msk.f32.mxu1 %vm2882_vm0, %v2883_v7 }
0x27b0   :  { %v1812_v18 = vpop.f32.mrb[14].mxu1 }
0x27b1   :  { %v1817_v19 = vrot.slane %v1812_v18, 4  ;;  %v2476_v20 = vpop.f32.mrb[15].mxu1 }
0x27b3   :  { %v1819_v21 = vadd.f32 %v1817_v19, %v3178_v23 }
0x27b5   :  { %2750 = vtanh.f32 %v1819_v21  ;;  %v2198_v24 = vmul.f32 -1.442695, %v1819_v21 }
0x27b7   :  { %2752 = vpow2.f32 %v2198_v24 }
0x27bf   :  { %v2751_v22 = vpop.eup %2750 }
0x27c0   :  { %1832 = vrot.lane.b32.xlu0 %v2751_v22, %s2884_s12 }
0x27c1   :  { %v2753_v26 = vpop.eup %2752 }
0x27c2   :  { %v1823_v27 = vadd.f32 1.0, %v2753_v26 }
0x27c4   :  { %2754 = vrcp.f32 %v1823_v27 }
0x27ce   :  { %v2755_v28 = vpop.eup %2754 }
0x27cf   :  { %v1830_v32 = vmul.f32 %v2755_v28, %v1828_v31 }
0x2832   :  { %v1833_v29 = vpop.permute.xlu0 %1832 }
0x2833   :  { %v1835_v30 = vmul.f32 %v2755_v28, %v1833_v29 }
0x2835   :  { %1837 = vrot.lane.b32.xlu1 %v1835_v30, %s2885_s1 }
0x28a7   :  { %v1838_v33 = vpop.permute.xlu1 %1837 }
0x28a8   :  { %v1840_v34 = vadd.f32 %v1838_v33, %v1830_v32 }
0x28aa   :  { %2756 = vtanh.f32 %v1840_v34 }
0x28b4   :  { %v2757_v35 = vpop.eup %2756 }
0x28b5   :  { %1843 = vrot.lane.b32.xlu0 %v2757_v35, %s2884_s12 }
0x2927   :  { %v1844_v36 = vpop.permute.xlu0 %1843 }
0x2928   :  { %v1846_v38 = vmul.f32 %v2755_v28, %v1844_v36 }
0x292a   :  { %v1848_v25 = vrot.slane %v1846_v38, 4 }
0x292c   :  { %1849 = vrot.lane.b32.xlu1 %v1848_v25, %s2885_s1 }
0x299e   :  { %v1850_v39 = vpop.permute.xlu1 %1849 }
0x299f   :  { %2486 = vmatmul.mubr.msk.f32.vlgmr.msra.gmra.mrb[16].mxu0 %vm120_vm2, %v1850_v39 }
0x29a0   :  { %2507 = vmatprep.mubr.msk.f32.mxu0 %vm2882_vm0, %v2883_v7  ;;  %v1935_v7 = vrot.slane %v1840_v34, 6  ;;  %2622 = vmatpush3.bf16.msra.mxu0 %v2621_v62 }
0x29a1   :  { %2623 = vmatprep.subr.bf16.mxu0 %v2881_v4 }
0x29a4   :  { %2625 = vmatpush3.bf16.msra.mxu0 %v2624_v8 }
0x2a72   :  { %v1919_v40 = vpop.f32.mrb[16].mxu0 }
0x2a73   :  { %v1924_v41 = vrot.slane %v1919_v40, 2  ;;  %v2487_v42 = vpop.f32.mrb[17].mxu0 }
0x2a75   :  { %v1926_v43 = vadd.f32 %v1924_v41, %v3178_v23  ;;  %v1954_v23 = vld [vmem:[#allocation10] sm:$0xff] }
0x2a76   :  { %v2615_v56 = vpack.c.bf16 %v1955_v54, %v1954_v23 }
0x2a77   :  { %2758 = vtanh.f32 %v1926_v43  ;;  %v2200_v45 = vmul.f32 -1.442695, %v1926_v43 }
0x2a78   :  { %2616 = vmatpush3.bf16.msra.mxu1 %v2615_v56 }
0x2a79   :  { %2760 = vpow2.f32 %v2200_v45  ;;  %2617 = vmatprep.subr.bf16.mxu1 %v2881_v4  ;;  %v2201_v4 = vld [vmem:[%s3293_s7] ss:$0 sm:$0xff] }
0x2a7c   :  { %2619 = vmatpush3.bf16.msra.mxu1 %v2618_v58 }
0x2a81   :  { %v2759_v44 = vpop.eup %2758 }
0x2a82   :  { %1939 = vrot.lane.b32.xlu0 %v2759_v44, %s2884_s12 }
0x2a83   :  { %v2761_v46 = vpop.eup %2760 }
0x2a84   :  { %v1930_v47 = vadd.f32 1.0, %v2761_v46 }
0x2a86   :  { %2762 = vrcp.f32 %v1930_v47 }
0x2a90   :  { %v2763_v48 = vpop.eup %2762 }
0x2a91   :  { %v1937_v51 = vmul.f32 %v2763_v48, %v1935_v7 }
0x2af4   :  { %v1940_v49 = vpop.permute.xlu0 %1939 }
0x2af5   :  { %v1942_v50 = vmul.f32 %v2763_v48, %v1940_v49 }
0x2af7   :  { %1944 = vrot.lane.b32.xlu1 %v1942_v50, %s2885_s1 }
0x2b69   :  { %v1945_v52 = vpop.permute.xlu1 %1944 }
0x2b6a   :  { %v1947_v53 = vadd.f32 %v1945_v52, %v1937_v51 }
0x2b6c   :  { %2764 = vtanh.f32 %v1947_v53 }
0x2b76   :  { %v2765_v59 = vpop.eup %2764 }
0x2b77   :  { %1950 = vrot.lane.b32.xlu0 %v2765_v59, %s2884_s12 }
0x2be9   :  { %v1951_v63 = vpop.permute.xlu0 %1950 }
0x2bea   :  { %v1953_v0 = vmul.f32 %v2763_v48, %v1951_v63 }
0x2bec   :  { %v1966_v5 = vrot.slane %v1953_v0, 6 }
0x2bee   :  { %1967 = vrot.lane.b32.xlu1 %v1966_v5, %s2885_s1 }
0x2c60   :  { %v1968_v2 = vpop.permute.xlu1 %1967 }
0x2c61   :  { %2497 = vmatmul.mubr.msk.f32.vlgmr.msra.gmra.mrb[16].mxu1 %vm120_vm2, %v1968_v2 }
0x2d34   :  { %v2037_v6 = vpop.f32.mrb[16].mxu1 }
0x2d35   :  { %v2038_v9 = vadd.f32 %v2201_v4, %v2037_v6  ;;  %v2498_v10 = vpop.f32.mrb[17].mxu1 }
0x2d37   :  { %v2041_v37 = vmax.f32 %v2038_v9, 0.0 }
0x2d39   :  { %2508 = vmatmul.mubr.msk.f32.vlgmr.msra.gmra.mrb[18].mxu0 %vm120_vm2, %v2041_v37 }
0x2e0c   :  { %v2122_v12 = vpop.f32.mrb[18].mxu0 }
0x2e0d   :  { %v2123_v13 = vadd.f32 %v2203_v11, %v2122_v12  ;;  %v2509_v14 = vpop.f32.mrb[19].mxu0 }
0x2e0f   :  { %2127 = vst.msk [vmem:[%s3296_s10] sm:$0x3] %vm2126_vm6, %v2123_v13 }
0x2e10   :  { %2132 = vsyncpa [#allocation4], 1 }
0x2e11   :  { %2133 = vsyncpa [#allocation8], 1 }
0x2e12   :  { %2134 = vsyncpa [#allocation11], 1 }
0x2e13   :  { %2135 = vsyncpa [#allocation5], 1 }

</bundles_post_ra>
